<compile_context>
chip_gen: v7x
topology: tpu7x:2x2x1
jax: 0.10.0
libtpu: 0.0.40
codegen_flags: <defaults>
</compile_context>

<pallas_src>
import functools
import math

import jax
import jax.numpy as jnp
import numpy as np
from jax import lax
from jax.experimental import pallas as pl
from jax.experimental.pallas import tpu as pltpu


# ----------------------------------------------------------------------------
# Pallas kernel: one grid step = one (batch, row-band) tile.
# ----------------------------------------------------------------------------
def _sgab_kernel(x_ref, w1_ref, w3_ref, w2t_ref, pch_ref, out_ref, cnv_ref,
                 *, C, H, W, R):
    N = R * W                    # interior lanes written by this step
    NEXT = (R + 4) * W           # interior + 2-row halo on each side
    PAD_L = 128                  # left canvas pad (>= 2, multiple of 128)
    t = pl.program_id(1)         # row-band index within the image

    x = x_ref[0, 0]              # (C, NEXT)  spatial on lanes, channels on sublanes

    # ---- unpack packed per-channel params (C, 29) ---------------------------
    pch = pch_ref[...]
    dw_taps = pch[:, 0:25]       # depthwise 5x5 taps
    ln_w = pch[:, 25:26]         # LayerNorm weight
    ln_b = pch[:, 26:27]         # LayerNorm bias
    dw_b = pch[:, 27:28]         # DWConv1 bias
    c2_b = pch[0:1, 28:29]       # Conv2 bias (scalar)

    # ---- LayerNorm over channels (channels_first semantics) ----------------
    u = jnp.mean(x, axis=0, keepdims=True)
    xc = x - u
    var = jnp.mean(xc * xc, axis=0, keepdims=True)
    xn = xc * lax.rsqrt(var + 1e-6) * ln_w + ln_b            # (C, NEXT)

    # ---- row-validity mask --------------------------------------------------
    # Halo rows outside the image must act like the reference conv's zero
    # padding *after* LayerNorm / Conv1, so zero xn / a there before the taps.
    # (Re-evaluated every grid step on purpose: no program_id==0 guard, so it
    # stays correct under megacore sharding.)
    fiota = lax.broadcasted_iota(jnp.int32, (1, NEXT), 1)
    lo = (2 - t * R) * W
    hi = (H + 2 - t * R) * W
    row_ok = (fiota >= lo) & (fiota < hi)
    xn_z = jnp.where(row_ok, xn, 0.0)            # Conv2 input (zero-padded)

    # ---- Conv1 (1x1): single fused (2C, C) @ (C, NEXT) MXU matmul -----------
    w1 = w1_ref[...]
    y = jnp.dot(w1[:, :C], xn, preferred_element_type=jnp.float32) + w1[:, C:C + 1]
    a_z = jnp.where(row_ok, y[:C, :], 0.0)       # DWConv1 input (zero-padded)
    g = y[C:, 2 * W:2 * W + N]                   # gating half, interior rows only

    # ---- column-wrap masks shared by the 5x5 and 3x3 taps -------------------
    widx = lax.broadcasted_iota(jnp.int32, (1, N), 1) % W
    col_ok = {dx: (widx >= -dx) & (widx < W - dx) for dx in (-2, -1, 1, 2)}

    # ---- DWConv1: depthwise 5x5, padding 2, on a_z --------------------------
    # Canvas = [PAD_L pad | a_z (NEXT lanes) | 2 pad]; tap (dy, dx) for interior
    # output position p is the static lane slice starting at
    # PAD_L + (2+dy)*W + dx.  Row halos are real (masked-to-zero) data; only
    # the column wrap needs the per-dx mask, applied once per dx group.
    cnv_ref[:, PAD_L - 2:PAD_L] = jnp.zeros((C, 2), jnp.float32)
    cnv_ref[:, PAD_L + NEXT:] = jnp.zeros((C, 2), jnp.float32)
    cnv_ref[:, PAD_L:PAD_L + NEXT] = a_z         # lane-aligned store

    dw = None
    for dx in (-2, -1, 0, 1, 2):
        t_dx = None
        for dy in (-2, -1, 0, 1, 2):
            k = (dy + 2) * 5 + (dx + 2)
            st = PAD_L + (2 + dy) * W + dx
            s = cnv_ref[:, st:st + N]
            term = s * dw_taps[:, k:k + 1]
            t_dx = term if t_dx is None else t_dx + term
        if dx != 0:                              # one column mask per dx group
            t_dx = jnp.where(col_ok[dx], t_dx, 0.0)
        dw = t_dx if dw is None else dw + t_dx
    u1 = g * (dw + dw_b)                         # x * DWConv1(a)      (C, N)

    # ---- Conv2: dense 3x3, C -> 1, on xn_z; channel reduction on the MXU ----
    p9 = jnp.dot(w2t_ref[...], xn_z, preferred_element_type=jnp.float32)  # (9, NEXT)
    s3 = None
    for dx in (-1, 0, 1):
        t_dx = None
        for dy in (-1, 0, 1):
            k = (dy + 1) * 3 + (dx + 1)
            st = (2 + dy) * W + dx
            row = p9[k:k + 1, st:st + N]         # (1, N) -- cheap row slice
            t_dx = row if t_dx is None else t_dx + row
        if dx != 0:
            t_dx = jnp.where(col_ok[dx], t_dx, 0.0)
        s3 = t_dx if s3 is None else s3 + t_dx
    s3 = s3 + c2_b                               # (1, N)
    u2 = xn_z[:, 2 * W:2 * W + N] * s3           # x2 * Conv2(x2)      (C, N)

    # ---- Conv3 (1x1) on cat([u1, u2]); concat folded into two MXU pushes ----
    w3 = w3_ref[...]
    out = (jnp.dot(w3[:, :C], u1, preferred_element_type=jnp.float32)
           + jnp.dot(w3[:, C:2 * C], u2, preferred_element_type=jnp.float32)
           + w3[:, 2 * C:2 * C + 1])
    out_ref[0] = out.astype(out_ref.dtype)


# ----------------------------------------------------------------------------
# Wrapper: pack PyTorch-layout params, build halo'd row-band tiles, pallas_call.
# ----------------------------------------------------------------------------
def _tile_rows(H, W, target_lanes=1024):
    """Rows per tile; R*W is kept a multiple of 128 so output blocks are lane-dense."""
    m = 128 // math.gcd(W, 128)          # R must be a multiple of m
    r = max(1, target_lanes // W)
    r = max(m, (r // m) * m)
    r = min(r, -(-H // m) * m)           # no taller than the (padded) image
    return r


def sgab_pallas(x_nchw, p, tile_rows=None):
    B, C, H, W = x_nchw.shape
    R = tile_rows if tile_rows is not None else _tile_rows(H, W)
    assert R % (128 // math.gcd(W, 128)) == 0, "R*W must be a multiple of 128"
    T = -(-H // R)
    Hpad = T * R
    N = R * W
    NEXT = (R + 4) * W
    PAD_L = 128

    x = x_nchw.astype(jnp.float32)
    # Halo'd row-band tiles (B, T, C, (R+4)*W), zero rows at image top/bottom.
    xp = jnp.pad(x, ((0, 0), (0, 0), (2, 2 + Hpad - H), (0, 0)))
    tiles = jnp.stack([xp[:, :, t * R:t * R + R + 4, :] for t in range(T)], axis=1)
    tiles = tiles.reshape(B, T, C, NEXT)

    # Pack the 10 torch parameters into 4 kernel operands (few, small DMAs).
    w1 = jnp.concatenate([p['c1_w'][:, :, 0, 0], p['c1_b'][:, None]],
                         axis=1).astype(jnp.float32)               # (2C, C+1)
    w3 = jnp.concatenate([p['c3_w'][:, :, 0, 0], p['c3_b'][:, None]],
                         axis=1).astype(jnp.float32)               # (C, 2C+1)
    w2t = p['c2_w'][0].reshape(C, 9).T.astype(jnp.float32)         # (9, C)
    pch = jnp.concatenate([
        p['dw_w'][:, 0].reshape(C, 25),
        p['ln_w'][:, None], p['ln_b'][:, None], p['dw_b'][:, None],
        jnp.broadcast_to(p['c2_b'].reshape(1, 1), (C, 1)),
    ], axis=1).astype(jnp.float32)                                 # (C, 29)

    kernel = functools.partial(_sgab_kernel, C=C, H=H, W=W, R=R)

    # VMEM budget: double-buffered in/out blocks + weights + canvas + headroom
    # for kernel intermediates (xn, y, a_z, xn_z, p9, dw, u1, u2, ...).
    blk_in = 4 * C * NEXT
    blk_out = 4 * C * N
    fixed = 4 * (w1.size + w3.size + w2t.size + pch.size) + 4 * C * (PAD_L + NEXT + 2)
    est = 2 * (blk_in + blk_out) + fixed + 24 * blk_in + (1 << 20)
    vmem_limit = int(min(64 * 2 ** 20, max(32 * 2 ** 20, 2 * est)))

    grid_spec = pltpu.PrefetchScalarGridSpec(
        num_scalar_prefetch=0,
        grid=(B, T),
        in_specs=[
            pl.BlockSpec((1, 1, C, NEXT), lambda b, t: (b, t, 0, 0)),
            pl.BlockSpec(w1.shape, lambda b, t: (0, 0)),
            pl.BlockSpec(w3.shape, lambda b, t: (0, 0)),
            pl.BlockSpec(w2t.shape, lambda b, t: (0, 0)),
            pl.BlockSpec(pch.shape, lambda b, t: (0, 0)),
        ],
        out_specs=pl.BlockSpec((1, C, N), lambda b, t: (b, 0, t)),  # lane-dense
        scratch_shapes=[pltpu.VMEM((C, PAD_L + NEXT + 2), jnp.float32)],
    )

    out_flat = pl.pallas_call(
        kernel,
        out_shape=jax.ShapeDtypeStruct((B, C, Hpad * W), jnp.float32),
        grid_spec=grid_spec,
        compiler_params=pltpu.CompilerParams(
            dimension_semantics=("parallel", "parallel"),  # batch x row-bands
            vmem_limit_bytes=vmem_limit),
    )(tiles, w1, w3, w2t, pch)
    return out_flat.reshape(B, C, Hpad, W)[:, :, :H, :]


# ----------------------------------------------------------------------------
# Deterministic parameter init (PyTorch weight layouts) + pure-JAX reference.
# ----------------------------------------------------------------------------
def init_params(key, n_feats):
    C = n_feats
    shapes = {
        'c1_w': (2 * C, C, 1, 1), 'c1_b': (2 * C,),
        'dw_w': (C, 1, 5, 5),     'dw_b': (C,),
        'c2_w': (1, C, 3, 3),     'c2_b': (1,),
        'c3_w': (C, 2 * C, 1, 1), 'c3_b': (C,),
    }
    keys = jax.random.split(key, len(shapes) + 2)
    p = {}
    for i, (name, shp) in enumerate(shapes.items()):
        p[name] = 0.1 * jax.random.normal(keys[i], shp, jnp.float32)
    p['ln_w'] = 1.0 + 0.1 * jax.random.normal(keys[-2], (C,), jnp.float32)
    p['ln_b'] = 0.1 * jax.random.normal(keys[-1], (C,), jnp.float32)
    # NOTE: SGAB defines `self.scale` but never uses it in forward(); omitted.
    return p


def _conv_ref(v, w, b, groups=1):
    k = w.shape[-1]
    pad = k // 2
    out = lax.conv_general_dilated(
        v, w, window_strides=(1, 1), padding=[(pad, pad), (pad, pad)],
        dimension_numbers=('NCHW', 'OIHW', 'NCHW'),
        feature_group_count=groups, precision=lax.Precision.HIGHEST)
    return out + b[None, :, None, None]


def reference(x, p):
    C = x.shape[1]
    u = x.mean(1, keepdims=True)
    s = ((x - u) ** 2).mean(1, keepdims=True)
    xn = (x - u) / jnp.sqrt(s + 1e-6)
    xn = p['ln_w'][None, :, None, None] * xn + p['ln_b'][None, :, None, None]
    y = _conv_ref(xn, p['c1_w'], p['c1_b'])
    a, g = y[:, :C], y[:, C:]
    u1 = g * _conv_ref(a, p['dw_w'], p['dw_b'], groups=C)
    u2 = xn * _conv_ref(xn, p['c2_w'], p['c2_b'])
    return _conv_ref(jnp.concatenate([u1, u2], axis=1), p['c3_w'], p['c3_b'])


if __name__ == "__main__":
    key = jax.random.PRNGKey(0)
    kx, kp = jax.random.split(key)
    B, C, H, W = 2, 4, 16, 16            # n_feats = 4
    x = jax.random.normal(kx, (B, C, H, W), jnp.float32)
    params = init_params(kp, C)

    # tile_rows=8 -> 2 row-bands per image, exercising the halo/tiling path.
    out = jax.block_until_ready(sgab_pallas(x, params, tile_rows=8))
    ref = jax.block_until_ready(reference(x, params))
    np.testing.assert_allclose(np.asarray(out), np.asarray(ref),
                               rtol=2e-3, atol=2e-3)
    print("KERNEL_OK")
</pallas_src>

<mosaic_0001>
module attributes {stable_mosaic.version = 11 : i64} {
  func.func @_sgab_kernel(%arg0: i32, %arg1: i32, %arg2: memref<1x1x4x192xf32, #tpu.memory_space<vmem>>, %arg3: memref<8x5xf32, #tpu.memory_space<vmem>>, %arg4: memref<4x9xf32, #tpu.memory_space<vmem>>, %arg5: memref<9x4xf32, #tpu.memory_space<vmem>>, %arg6: memref<4x29xf32, #tpu.memory_space<vmem>>, %arg7: memref<1x4x128xf32, #tpu.memory_space<vmem>>, %arg8: memref<4x322xf32, #tpu.memory_space<vmem>>) attributes {dimension_semantics = [#tpu.dimension_semantics<parallel>, #tpu.dimension_semantics<parallel>], iteration_bounds = array<i64: 2, 2>, scalar_prefetch = 0 : i64, scratch_operands = 1 : i64, tpu.core_type = #tpu.core_type<tc>, window_params = [{transform_indices = @transform_0, window_bounds = array<i64: 1, 1, 4, 192>}, {pipeline_mode = #tpu.pipeline_mode<synchronous>, transform_indices = @transform_1, window_bounds = array<i64: 8, 5>}, {pipeline_mode = #tpu.pipeline_mode<synchronous>, transform_indices = @transform_2, window_bounds = array<i64: 4, 9>}, {pipeline_mode = #tpu.pipeline_mode<synchronous>, transform_indices = @transform_3, window_bounds = array<i64: 9, 4>}, {pipeline_mode = #tpu.pipeline_mode<synchronous>, transform_indices = @transform_4, window_bounds = array<i64: 4, 29>}, {transform_indices = @transform_5, window_bounds = array<i64: 1, 4, 128>}]} {
    %c0 = arith.constant 0 : index
    %c0_0 = arith.constant 0 : index
    %c0_1 = arith.constant 0 : index
    %c0_2 = arith.constant 0 : index
    %0 = vector.load %arg2[%c0, %c0_0, %c0_1, %c0_2] : memref<1x1x4x192xf32, #tpu.memory_space<vmem>>, vector<1x1x4x192xf32>
    %1 = vector.shape_cast %0 : vector<1x1x4x192xf32> to vector<4x192xf32>
    %c0_3 = arith.constant 0 : index
    %c0_4 = arith.constant 0 : index
    %2 = vector.load %arg6[%c0_3, %c0_4] : memref<4x29xf32, #tpu.memory_space<vmem>>, vector<4x29xf32>
    %3 = vector.extract_strided_slice %2 {offsets = [0, 0], sizes = [4, 25], strides = [1, 1]} : vector<4x29xf32> to vector<4x25xf32>
    %4 = vector.extract_strided_slice %2 {offsets = [0, 25], sizes = [4, 1], strides = [1, 1]} : vector<4x29xf32> to vector<4x1xf32>
    %5 = vector.extract_strided_slice %2 {offsets = [0, 26], sizes = [4, 1], strides = [1, 1]} : vector<4x29xf32> to vector<4x1xf32>
    %6 = vector.extract_strided_slice %2 {offsets = [0, 27], sizes = [4, 1], strides = [1, 1]} : vector<4x29xf32> to vector<4x1xf32>
    %7 = vector.extract_strided_slice %2 {offsets = [0, 28], sizes = [1, 1], strides = [1, 1]} : vector<4x29xf32> to vector<1x1xf32>
    %cst = arith.constant dense<0.000000e+00> : vector<192xf32>
    %8 = vector.multi_reduction <add>, %1, %cst [0] : vector<4x192xf32> to vector<192xf32>
    %9 = vector.shape_cast %8 : vector<192xf32> to vector<1x192xf32>
    %cst_5 = arith.constant 4.000000e+00 : f32
    %10 = vector.broadcast %cst_5 : f32 to vector<1x192xf32>
    %11 = arith.divf %9, %10 : vector<1x192xf32>
    %12 = vector.broadcast %11 : vector<1x192xf32> to vector<4x192xf32>
    %13 = arith.subf %1, %12 : vector<4x192xf32>
    %14 = arith.mulf %13, %13 : vector<4x192xf32>
    %cst_6 = arith.constant dense<0.000000e+00> : vector<192xf32>
    %15 = vector.multi_reduction <add>, %14, %cst_6 [0] : vector<4x192xf32> to vector<192xf32>
    %16 = vector.shape_cast %15 : vector<192xf32> to vector<1x192xf32>
    %cst_7 = arith.constant 4.000000e+00 : f32
    %17 = vector.broadcast %cst_7 : f32 to vector<1x192xf32>
    %18 = arith.divf %16, %17 : vector<1x192xf32>
    %cst_8 = arith.constant 9.99999997E-7 : f32
    %19 = vector.broadcast %cst_8 : f32 to vector<1x192xf32>
    %20 = arith.addf %18, %19 : vector<1x192xf32>
    %21 = math.rsqrt %20 : vector<1x192xf32>
    %22 = vector.broadcast %21 : vector<1x192xf32> to vector<4x192xf32>
    %23 = arith.mulf %13, %22 : vector<4x192xf32>
    %24 = vector.broadcast %4 : vector<4x1xf32> to vector<4x192xf32>
    %25 = arith.mulf %23, %24 : vector<4x192xf32>
    %26 = vector.broadcast %5 : vector<4x1xf32> to vector<4x192xf32>
    %27 = arith.addf %25, %26 : vector<4x192xf32>
    %28 = tpu.iota {dimensions = array<i32: 1>} : vector<1x192xi32>
    %c8_i32 = arith.constant 8 : i32
    %29 = arith.muli %arg1, %c8_i32 : i32
    %c2_i32 = arith.constant 2 : i32
    %30 = arith.subi %c2_i32, %29 : i32
    %c16_i32 = arith.constant 16 : i32
    %31 = arith.muli %30, %c16_i32 : i32
    %c8_i32_9 = arith.constant 8 : i32
    %32 = arith.muli %arg1, %c8_i32_9 : i32
    %c18_i32 = arith.constant 18 : i32
    %33 = arith.subi %c18_i32, %32 : i32
    %c16_i32_10 = arith.constant 16 : i32
    %34 = arith.muli %33, %c16_i32_10 : i32
    %35 = vector.broadcast %31 : i32 to vector<1x192xi32>
    %36 = arith.cmpi sge, %28, %35 : vector<1x192xi32>
    %37 = vector.broadcast %34 : i32 to vector<1x192xi32>
    %38 = arith.cmpi slt, %28, %37 : vector<1x192xi32>
    %39 = arith.andi %36, %38 : vector<1x192xi1>
    %cst_11 = arith.constant 0.000000e+00 : f32
    %40 = vector.shape_cast %39 : vector<1x192xi1> to vector<1x192xi1>
    %41 = vector.broadcast %40 : vector<1x192xi1> to vector<4x192xi1>
    %42 = vector.broadcast %cst_11 : f32 to vector<4x192xf32>
    %43 = arith.select %41, %27, %42 : vector<4x192xi1>, vector<4x192xf32>
    %c0_12 = arith.constant 0 : index
    %c0_13 = arith.constant 0 : index
    %44 = vector.load %arg3[%c0_12, %c0_13] : memref<8x5xf32, #tpu.memory_space<vmem>>, vector<8x5xf32>
    %45 = vector.extract_strided_slice %44 {offsets = [0, 0], sizes = [8, 4], strides = [1, 1]} : vector<8x5xf32> to vector<8x4xf32>
    %cst_14 = arith.constant dense<0.000000e+00> : vector<8x192xf32>
    %46 = tpu.matmul %45, %27, %cst_14 {dimension_numbers = #tpu.dot_dimension_numbers<[1], [0], [0], [1], [0, 0, 1, 1], [], []>} : vector<8x4xf32>, vector<4x192xf32>, vector<8x192xf32> -> vector<8x192xf32>
    %47 = vector.extract_strided_slice %44 {offsets = [0, 4], sizes = [8, 1], strides = [1, 1]} : vector<8x5xf32> to vector<8x1xf32>
    %48 = vector.broadcast %47 : vector<8x1xf32> to vector<8x192xf32>
    %49 = arith.addf %46, %48 : vector<8x192xf32>
    %50 = vector.extract_strided_slice %49 {offsets = [0, 0], sizes = [4, 192], strides = [1, 1]} : vector<8x192xf32> to vector<4x192xf32>
    %cst_15 = arith.constant 0.000000e+00 : f32
    %51 = vector.shape_cast %39 : vector<1x192xi1> to vector<1x192xi1>
    %52 = vector.broadcast %51 : vector<1x192xi1> to vector<4x192xi1>
    %53 = vector.broadcast %cst_15 : f32 to vector<4x192xf32>
    %54 = arith.select %52, %50, %53 : vector<4x192xi1>, vector<4x192xf32>
    %55 = vector.extract_strided_slice %49 {offsets = [4, 32], sizes = [4, 128], strides = [1, 1]} : vector<8x192xf32> to vector<4x128xf32>
    %56 = tpu.iota {dimensions = array<i32: 1>} : vector<1x128xi32>
    %c16_i32_16 = arith.constant 16 : i32
    %c0_i32 = arith.constant 0 : i32
    %57 = arith.cmpi eq, %c16_i32_16, %c0_i32 : i32
    %c1_i32 = arith.constant 1 : i32
    %58 = arith.select %57, %c1_i32, %c16_i32_16 : i32
    %59 = vector.broadcast %58 : i32 to vector<1x128xi32>
    %60 = arith.remsi %56, %59 : vector<1x128xi32>
    %c0_i32_17 = arith.constant 0 : i32
    %61 = vector.broadcast %c0_i32_17 : i32 to vector<1x128xi32>
    %62 = arith.cmpi ne, %60, %61 : vector<1x128xi32>
    %c0_i32_18 = arith.constant 0 : i32
    %63 = vector.broadcast %c0_i32_18 : i32 to vector<1x128xi32>
    %64 = arith.cmpi slt, %60, %63 : vector<1x128xi32>
    %c0_i32_19 = arith.constant 0 : i32
    %65 = arith.cmpi slt, %58, %c0_i32_19 : i32
    %66 = vector.broadcast %65 : i1 to vector<1x128xi1>
    %67 = vector.broadcast %66 : vector<1x128xi1> to vector<1x128xi1>
    %68 = arith.xori %64, %67 : vector<1x128xi1>
    %69 = arith.andi %68, %62 : vector<1x128xi1>
    %70 = vector.broadcast %58 : i32 to vector<1x128xi32>
    %71 = arith.addi %60, %70 : vector<1x128xi32>
    %72 = arith.select %69, %71, %60 : vector<1x128xi1>, vector<1x128xi32>
    %c2_i32_20 = arith.constant 2 : i32
    %73 = vector.broadcast %c2_i32_20 : i32 to vector<1x128xi32>
    %74 = arith.cmpi sge, %72, %73 : vector<1x128xi32>
    %c18_i32_21 = arith.constant 18 : i32
    %75 = vector.broadcast %c18_i32_21 : i32 to vector<1x128xi32>
    %76 = arith.cmpi slt, %72, %75 : vector<1x128xi32>
    %77 = arith.andi %74, %76 : vector<1x128xi1>
    %c1_i32_22 = arith.constant 1 : i32
    %78 = vector.broadcast %c1_i32_22 : i32 to vector<1x128xi32>
    %79 = arith.cmpi sge, %72, %78 : vector<1x128xi32>
    %c17_i32 = arith.constant 17 : i32
    %80 = vector.broadcast %c17_i32 : i32 to vector<1x128xi32>
    %81 = arith.cmpi slt, %72, %80 : vector<1x128xi32>
    %82 = arith.andi %79, %81 : vector<1x128xi1>
    %c-1_i32 = arith.constant -1 : i32
    %83 = vector.broadcast %c-1_i32 : i32 to vector<1x128xi32>
    %84 = arith.cmpi sge, %72, %83 : vector<1x128xi32>
    %c15_i32 = arith.constant 15 : i32
    %85 = vector.broadcast %c15_i32 : i32 to vector<1x128xi32>
    %86 = arith.cmpi slt, %72, %85 : vector<1x128xi32>
    %87 = arith.andi %84, %86 : vector<1x128xi1>
    %c-2_i32 = arith.constant -2 : i32
    %88 = vector.broadcast %c-2_i32 : i32 to vector<1x128xi32>
    %89 = arith.cmpi sge, %72, %88 : vector<1x128xi32>
    %c14_i32 = arith.constant 14 : i32
    %90 = vector.broadcast %c14_i32 : i32 to vector<1x128xi32>
    %91 = arith.cmpi slt, %72, %90 : vector<1x128xi32>
    %92 = arith.andi %89, %91 : vector<1x128xi1>
    %cst_23 = arith.constant 0.000000e+00 : f32
    %93 = vector.broadcast %cst_23 : f32 to vector<4x2xf32>
    %c0_24 = arith.constant 0 : index
    %c126 = arith.constant 126 : index
    %94 = vector.load %arg8[%c0_24, %c126] : memref<4x322xf32, #tpu.memory_space<vmem>>, vector<4x2xf32>
    tpu.vector_store %arg8[%c0_24, %c126], %93 {strides = array<i32>} : memref<4x322xf32, #tpu.memory_space<vmem>>, vector<4x2xf32>,
    %cst_25 = arith.constant 0.000000e+00 : f32
    %95 = vector.broadcast %cst_25 : f32 to vector<4x2xf32>
    %c0_26 = arith.constant 0 : index
    %c320 = arith.constant 320 : index
    %96 = vector.load %arg8[%c0_26, %c320] : memref<4x322xf32, #tpu.memory_space<vmem>>, vector<4x2xf32>
    tpu.vector_store %arg8[%c0_26, %c320], %95 {strides = array<i32>} : memref<4x322xf32, #tpu.memory_space<vmem>>, vector<4x2xf32>,
    %c0_27 = arith.constant 0 : index
    %c128 = arith.constant 128 : index
    %97 = vector.load %arg8[%c0_27, %c128] : memref<4x322xf32, #tpu.memory_space<vmem>>, vector<4x192xf32>
    tpu.vector_store %arg8[%c0_27, %c128], %54 {strides = array<i32>} : memref<4x322xf32, #tpu.memory_space<vmem>>, vector<4x192xf32>,
    %c0_28 = arith.constant 0 : index
    %c126_29 = arith.constant 126 : index
    %98 = vector.load %arg8[%c0_28, %c126_29] : memref<4x322xf32, #tpu.memory_space<vmem>>, vector<4x128xf32>
    %99 = vector.extract_strided_slice %3 {offsets = [0, 0], sizes = [4, 1], strides = [1, 1]} : vector<4x25xf32> to vector<4x1xf32>
    %100 = vector.broadcast %99 : vector<4x1xf32> to vector<4x128xf32>
    %101 = arith.mulf %98, %100 : vector<4x128xf32>
    %c0_30 = arith.constant 0 : index
    %c142 = arith.constant 142 : index
    %102 = vector.load %arg8[%c0_30, %c142] : memref<4x322xf32, #tpu.memory_space<vmem>>, vector<4x128xf32>
    %103 = vector.extract_strided_slice %3 {offsets = [0, 5], sizes = [4, 1], strides = [1, 1]} : vector<4x25xf32> to vector<4x1xf32>
    %104 = vector.broadcast %103 : vector<4x1xf32> to vector<4x128xf32>
    %105 = arith.mulf %102, %104 : vector<4x128xf32>
    %106 = arith.addf %101, %105 : vector<4x128xf32>
    %c0_31 = arith.constant 0 : index
    %c158 = arith.constant 158 : index
    %107 = vector.load %arg8[%c0_31, %c158] : memref<4x322xf32, #tpu.memory_space<vmem>>, vector<4x128xf32>
    %108 = vector.extract_strided_slice %3 {offsets = [0, 10], sizes = [4, 1], strides = [1, 1]} : vector<4x25xf32> to vector<4x1xf32>
    %109 = vector.broadcast %108 : vector<4x1xf32> to vector<4x128xf32>
    %110 = arith.mulf %107, %109 : vector<4x128xf32>
    %111 = arith.addf %106, %110 : vector<4x128xf32>
    %c0_32 = arith.constant 0 : index
    %c174 = arith.constant 174 : index
    %112 = vector.load %arg8[%c0_32, %c174] : memref<4x322xf32, #tpu.memory_space<vmem>>, vector<4x128xf32>
    %113 = vector.extract_strided_slice %3 {offsets = [0, 15], sizes = [4, 1], strides = [1, 1]} : vector<4x25xf32> to vector<4x1xf32>
    %114 = vector.broadcast %113 : vector<4x1xf32> to vector<4x128xf32>
    %115 = arith.mulf %112, %114 : vector<4x128xf32>
    %116 = arith.addf %111, %115 : vector<4x128xf32>
    %c0_33 = arith.constant 0 : index
    %c190 = arith.constant 190 : index
    %117 = vector.load %arg8[%c0_33, %c190] : memref<4x322xf32, #tpu.memory_space<vmem>>, vector<4x128xf32>
    %118 = vector.extract_strided_slice %3 {offsets = [0, 20], sizes = [4, 1], strides = [1, 1]} : vector<4x25xf32> to vector<4x1xf32>
    %119 = vector.broadcast %118 : vector<4x1xf32> to vector<4x128xf32>
    %120 = arith.mulf %117, %119 : vector<4x128xf32>
    %121 = arith.addf %116, %120 : vector<4x128xf32>
    %cst_34 = arith.constant 0.000000e+00 : f32
    %122 = vector.shape_cast %77 : vector<1x128xi1> to vector<1x128xi1>
    %123 = vector.broadcast %122 : vector<1x128xi1> to vector<4x128xi1>
    %124 = vector.broadcast %cst_34 : f32 to vector<4x128xf32>
    %125 = arith.select %123, %121, %124 : vector<4x128xi1>, vector<4x128xf32>
    %c0_35 = arith.constant 0 : index
    %c127 = arith.constant 127 : index
    %126 = vector.load %arg8[%c0_35, %c127] : memref<4x322xf32, #tpu.memory_space<vmem>>, vector<4x128xf32>
    %127 = vector.extract_strided_slice %3 {offsets = [0, 1], sizes = [4, 1], strides = [1, 1]} : vector<4x25xf32> to vector<4x1xf32>
    %128 = vector.broadcast %127 : vector<4x1xf32> to vector<4x128xf32>
    %129 = arith.mulf %126, %128 : vector<4x128xf32>
    %c0_36 = arith.constant 0 : index
    %c143 = arith.constant 143 : index
    %130 = vector.load %arg8[%c0_36, %c143] : memref<4x322xf32, #tpu.memory_space<vmem>>, vector<4x128xf32>
    %131 = vector.extract_strided_slice %3 {offsets = [0, 6], sizes = [4, 1], strides = [1, 1]} : vector<4x25xf32> to vector<4x1xf32>
    %132 = vector.broadcast %131 : vector<4x1xf32> to vector<4x128xf32>
    %133 = arith.mulf %130, %132 : vector<4x128xf32>
    %134 = arith.addf %129, %133 : vector<4x128xf32>
    %c0_37 = arith.constant 0 : index
    %c159 = arith.constant 159 : index
    %135 = vector.load %arg8[%c0_37, %c159] : memref<4x322xf32, #tpu.memory_space<vmem>>, vector<4x128xf32>
    %136 = vector.extract_strided_slice %3 {offsets = [0, 11], sizes = [4, 1], strides = [1, 1]} : vector<4x25xf32> to vector<4x1xf32>
    %137 = vector.broadcast %136 : vector<4x1xf32> to vector<4x128xf32>
    %138 = arith.mulf %135, %137 : vector<4x128xf32>
    %139 = arith.addf %134, %138 : vector<4x128xf32>
    %c0_38 = arith.constant 0 : index
    %c175 = arith.constant 175 : index
    %140 = vector.load %arg8[%c0_38, %c175] : memref<4x322xf32, #tpu.memory_space<vmem>>, vector<4x128xf32>
    %141 = vector.extract_strided_slice %3 {offsets = [0, 16], sizes = [4, 1], strides = [1, 1]} : vector<4x25xf32> to vector<4x1xf32>
    %142 = vector.broadcast %141 : vector<4x1xf32> to vector<4x128xf32>
    %143 = arith.mulf %140, %142 : vector<4x128xf32>
    %144 = arith.addf %139, %143 : vector<4x128xf32>
    %c0_39 = arith.constant 0 : index
    %c191 = arith.constant 191 : index
    %145 = vector.load %arg8[%c0_39, %c191] : memref<4x322xf32, #tpu.memory_space<vmem>>, vector<4x128xf32>
    %146 = vector.extract_strided_slice %3 {offsets = [0, 21], sizes = [4, 1], strides = [1, 1]} : vector<4x25xf32> to vector<4x1xf32>
    %147 = vector.broadcast %146 : vector<4x1xf32> to vector<4x128xf32>
    %148 = arith.mulf %145, %147 : vector<4x128xf32>
    %149 = arith.addf %144, %148 : vector<4x128xf32>
    %cst_40 = arith.constant 0.000000e+00 : f32
    %150 = vector.shape_cast %82 : vector<1x128xi1> to vector<1x128xi1>
    %151 = vector.broadcast %150 : vector<1x128xi1> to vector<4x128xi1>
    %152 = vector.broadcast %cst_40 : f32 to vector<4x128xf32>
    %153 = arith.select %151, %149, %152 : vector<4x128xi1>, vector<4x128xf32>
    %154 = arith.addf %125, %153 : vector<4x128xf32>
    %c0_41 = arith.constant 0 : index
    %c128_42 = arith.constant 128 : index
    %155 = vector.load %arg8[%c0_41, %c128_42] : memref<4x322xf32, #tpu.memory_space<vmem>>, vector<4x128xf32>
    %156 = vector.extract_strided_slice %3 {offsets = [0, 2], sizes = [4, 1], strides = [1, 1]} : vector<4x25xf32> to vector<4x1xf32>
    %157 = vector.broadcast %156 : vector<4x1xf32> to vector<4x128xf32>
    %158 = arith.mulf %155, %157 : vector<4x128xf32>
    %c0_43 = arith.constant 0 : index
    %c144 = arith.constant 144 : index
    %159 = vector.load %arg8[%c0_43, %c144] : memref<4x322xf32, #tpu.memory_space<vmem>>, vector<4x128xf32>
    %160 = vector.extract_strided_slice %3 {offsets = [0, 7], sizes = [4, 1], strides = [1, 1]} : vector<4x25xf32> to vector<4x1xf32>
    %161 = vector.broadcast %160 : vector<4x1xf32> to vector<4x128xf32>
    %162 = arith.mulf %159, %161 : vector<4x128xf32>
    %163 = arith.addf %158, %162 : vector<4x128xf32>
    %c0_44 = arith.constant 0 : index
    %c160 = arith.constant 160 : index
    %164 = vector.load %arg8[%c0_44, %c160] : memref<4x322xf32, #tpu.memory_space<vmem>>, vector<4x128xf32>
    %165 = vector.extract_strided_slice %3 {offsets = [0, 12], sizes = [4, 1], strides = [1, 1]} : vector<4x25xf32> to vector<4x1xf32>
    %166 = vector.broadcast %165 : vector<4x1xf32> to vector<4x128xf32>
    %167 = arith.mulf %164, %166 : vector<4x128xf32>
    %168 = arith.addf %163, %167 : vector<4x128xf32>
    %c0_45 = arith.constant 0 : index
    %c176 = arith.constant 176 : index
    %169 = vector.load %arg8[%c0_45, %c176] : memref<4x322xf32, #tpu.memory_space<vmem>>, vector<4x128xf32>
    %170 = vector.extract_strided_slice %3 {offsets = [0, 17], sizes = [4, 1], strides = [1, 1]} : vector<4x25xf32> to vector<4x1xf32>
    %171 = vector.broadcast %170 : vector<4x1xf32> to vector<4x128xf32>
    %172 = arith.mulf %169, %171 : vector<4x128xf32>
    %173 = arith.addf %168, %172 : vector<4x128xf32>
    %c0_46 = arith.constant 0 : index
    %c192 = arith.constant 192 : index
    %174 = vector.load %arg8[%c0_46, %c192] : memref<4x322xf32, #tpu.memory_space<vmem>>, vector<4x128xf32>
    %175 = vector.extract_strided_slice %3 {offsets = [0, 22], sizes = [4, 1], strides = [1, 1]} : vector<4x25xf32> to vector<4x1xf32>
    %176 = vector.broadcast %175 : vector<4x1xf32> to vector<4x128xf32>
    %177 = arith.mulf %174, %176 : vector<4x128xf32>
    %178 = arith.addf %173, %177 : vector<4x128xf32>
    %179 = arith.addf %154, %178 : vector<4x128xf32>
    %c0_47 = arith.constant 0 : index
    %c129 = arith.constant 129 : index
    %180 = vector.load %arg8[%c0_47, %c129] : memref<4x322xf32, #tpu.memory_space<vmem>>, vector<4x128xf32>
    %181 = vector.extract_strided_slice %3 {offsets = [0, 3], sizes = [4, 1], strides = [1, 1]} : vector<4x25xf32> to vector<4x1xf32>
    %182 = vector.broadcast %181 : vector<4x1xf32> to vector<4x128xf32>
    %183 = arith.mulf %180, %182 : vector<4x128xf32>
    %c0_48 = arith.constant 0 : index
    %c145 = arith.constant 145 : index
    %184 = vector.load %arg8[%c0_48, %c145] : memref<4x322xf32, #tpu.memory_space<vmem>>, vector<4x128xf32>
    %185 = vector.extract_strided_slice %3 {offsets = [0, 8], sizes = [4, 1], strides = [1, 1]} : vector<4x25xf32> to vector<4x1xf32>
    %186 = vector.broadcast %185 : vector<4x1xf32> to vector<4x128xf32>
    %187 = arith.mulf %184, %186 : vector<4x128xf32>
    %188 = arith.addf %183, %187 : vector<4x128xf32>
    %c0_49 = arith.constant 0 : index
    %c161 = arith.constant 161 : index
    %189 = vector.load %arg8[%c0_49, %c161] : memref<4x322xf32, #tpu.memory_space<vmem>>, vector<4x128xf32>
    %190 = vector.extract_strided_slice %3 {offsets = [0, 13], sizes = [4, 1], strides = [1, 1]} : vector<4x25xf32> to vector<4x1xf32>
    %191 = vector.broadcast %190 : vector<4x1xf32> to vector<4x128xf32>
    %192 = arith.mulf %189, %191 : vector<4x128xf32>
    %193 = arith.addf %188, %192 : vector<4x128xf32>
    %c0_50 = arith.constant 0 : index
    %c177 = arith.constant 177 : index
    %194 = vector.load %arg8[%c0_50, %c177] : memref<4x322xf32, #tpu.memory_space<vmem>>, vector<4x128xf32>
    %195 = vector.extract_strided_slice %3 {offsets = [0, 18], sizes = [4, 1], strides = [1, 1]} : vector<4x25xf32> to vector<4x1xf32>
    %196 = vector.broadcast %195 : vector<4x1xf32> to vector<4x128xf32>
    %197 = arith.mulf %194, %196 : vector<4x128xf32>
    %198 = arith.addf %193, %197 : vector<4x128xf32>
    %c0_51 = arith.constant 0 : index
    %c193 = arith.constant 193 : index
    %199 = vector.load %arg8[%c0_51, %c193] : memref<4x322xf32, #tpu.memory_space<vmem>>, vector<4x128xf32>
    %200 = vector.extract_strided_slice %3 {offsets = [0, 23], sizes = [4, 1], strides = [1, 1]} : vector<4x25xf32> to vector<4x1xf32>
    %201 = vector.broadcast %200 : vector<4x1xf32> to vector<4x128xf32>
    %202 = arith.mulf %199, %201 : vector<4x128xf32>
    %203 = arith.addf %198, %202 : vector<4x128xf32>
    %cst_52 = arith.constant 0.000000e+00 : f32
    %204 = vector.shape_cast %87 : vector<1x128xi1> to vector<1x128xi1>
    %205 = vector.broadcast %204 : vector<1x128xi1> to vector<4x128xi1>
    %206 = vector.broadcast %cst_52 : f32 to vector<4x128xf32>
    %207 = arith.select %205, %203, %206 : vector<4x128xi1>, vector<4x128xf32>
    %208 = arith.addf %179, %207 : vector<4x128xf32>
    %c0_53 = arith.constant 0 : index
    %c130 = arith.constant 130 : index
    %209 = vector.load %arg8[%c0_53, %c130] : memref<4x322xf32, #tpu.memory_space<vmem>>, vector<4x128xf32>
    %210 = vector.extract_strided_slice %3 {offsets = [0, 4], sizes = [4, 1], strides = [1, 1]} : vector<4x25xf32> to vector<4x1xf32>
    %211 = vector.broadcast %210 : vector<4x1xf32> to vector<4x128xf32>
    %212 = arith.mulf %209, %211 : vector<4x128xf32>
    %c0_54 = arith.constant 0 : index
    %c146 = arith.constant 146 : index
    %213 = vector.load %arg8[%c0_54, %c146] : memref<4x322xf32, #tpu.memory_space<vmem>>, vector<4x128xf32>
    %214 = vector.extract_strided_slice %3 {offsets = [0, 9], sizes = [4, 1], strides = [1, 1]} : vector<4x25xf32> to vector<4x1xf32>
    %215 = vector.broadcast %214 : vector<4x1xf32> to vector<4x128xf32>
    %216 = arith.mulf %213, %215 : vector<4x128xf32>
    %217 = arith.addf %212, %216 : vector<4x128xf32>
    %c0_55 = arith.constant 0 : index
    %c162 = arith.constant 162 : index
    %218 = vector.load %arg8[%c0_55, %c162] : memref<4x322xf32, #tpu.memory_space<vmem>>, vector<4x128xf32>
    %219 = vector.extract_strided_slice %3 {offsets = [0, 14], sizes = [4, 1], strides = [1, 1]} : vector<4x25xf32> to vector<4x1xf32>
    %220 = vector.broadcast %219 : vector<4x1xf32> to vector<4x128xf32>
    %221 = arith.mulf %218, %220 : vector<4x128xf32>
    %222 = arith.addf %217, %221 : vector<4x128xf32>
    %c0_56 = arith.constant 0 : index
    %c178 = arith.constant 178 : index
    %223 = vector.load %arg8[%c0_56, %c178] : memref<4x322xf32, #tpu.memory_space<vmem>>, vector<4x128xf32>
    %224 = vector.extract_strided_slice %3 {offsets = [0, 19], sizes = [4, 1], strides = [1, 1]} : vector<4x25xf32> to vector<4x1xf32>
    %225 = vector.broadcast %224 : vector<4x1xf32> to vector<4x128xf32>
    %226 = arith.mulf %223, %225 : vector<4x128xf32>
    %227 = arith.addf %222, %226 : vector<4x128xf32>
    %c0_57 = arith.constant 0 : index
    %c194 = arith.constant 194 : index
    %228 = vector.load %arg8[%c0_57, %c194] : memref<4x322xf32, #tpu.memory_space<vmem>>, vector<4x128xf32>
    %229 = vector.extract_strided_slice %3 {offsets = [0, 24], sizes = [4, 1], strides = [1, 1]} : vector<4x25xf32> to vector<4x1xf32>
    %230 = vector.broadcast %229 : vector<4x1xf32> to vector<4x128xf32>
    %231 = arith.mulf %228, %230 : vector<4x128xf32>
    %232 = arith.addf %227, %231 : vector<4x128xf32>
    %cst_58 = arith.constant 0.000000e+00 : f32
    %233 = vector.shape_cast %92 : vector<1x128xi1> to vector<1x128xi1>
    %234 = vector.broadcast %233 : vector<1x128xi1> to vector<4x128xi1>
    %235 = vector.broadcast %cst_58 : f32 to vector<4x128xf32>
    %236 = arith.select %234, %232, %235 : vector<4x128xi1>, vector<4x128xf32>
    %237 = arith.addf %208, %236 : vector<4x128xf32>
    %238 = vector.broadcast %6 : vector<4x1xf32> to vector<4x128xf32>
    %239 = arith.addf %237, %238 : vector<4x128xf32>
    %240 = arith.mulf %55, %239 : vector<4x128xf32>
    %c0_59 = arith.constant 0 : index
    %c0_60 = arith.constant 0 : index
    %241 = vector.load %arg5[%c0_59, %c0_60] : memref<9x4xf32, #tpu.memory_space<vmem>>, vector<9x4xf32>
    %cst_61 = arith.constant dense<0.000000e+00> : vector<9x192xf32>
    %242 = tpu.matmul %241, %43, %cst_61 {dimension_numbers = #tpu.dot_dimension_numbers<[1], [0], [0], [1], [0, 0, 1, 1], [], []>} : vector<9x4xf32>, vector<4x192xf32>, vector<9x192xf32> -> vector<9x192xf32>
    %243 = vector.extract_strided_slice %242 {offsets = [0, 15], sizes = [1, 128], strides = [1, 1]} : vector<9x192xf32> to vector<1x128xf32>
    %244 = vector.extract_strided_slice %242 {offsets = [3, 31], sizes = [1, 128], strides = [1, 1]} : vector<9x192xf32> to vector<1x128xf32>
    %245 = arith.addf %243, %244 : vector<1x128xf32>
    %246 = vector.extract_strided_slice %242 {offsets = [6, 47], sizes = [1, 128], strides = [1, 1]} : vector<9x192xf32> to vector<1x128xf32>
    %247 = arith.addf %245, %246 : vector<1x128xf32>
    %cst_62 = arith.constant 0.000000e+00 : f32
    %248 = vector.broadcast %cst_62 : f32 to vector<1x128xf32>
    %249 = arith.select %82, %247, %248 : vector<1x128xi1>, vector<1x128xf32>
    %250 = vector.extract_strided_slice %242 {offsets = [1, 16], sizes = [1, 128], strides = [1, 1]} : vector<9x192xf32> to vector<1x128xf32>
    %251 = vector.extract_strided_slice %242 {offsets = [4, 32], sizes = [1, 128], strides = [1, 1]} : vector<9x192xf32> to vector<1x128xf32>
    %252 = arith.addf %250, %251 : vector<1x128xf32>
    %253 = vector.extract_strided_slice %242 {offsets = [7, 48], sizes = [1, 128], strides = [1, 1]} : vector<9x192xf32> to vector<1x128xf32>
    %254 = arith.addf %252, %253 : vector<1x128xf32>
    %255 = arith.addf %249, %254 : vector<1x128xf32>
    %256 = vector.extract_strided_slice %242 {offsets = [2, 17], sizes = [1, 128], strides = [1, 1]} : vector<9x192xf32> to vector<1x128xf32>
    %257 = vector.extract_strided_slice %242 {offsets = [5, 33], sizes = [1, 128], strides = [1, 1]} : vector<9x192xf32> to vector<1x128xf32>
    %258 = arith.addf %256, %257 : vector<1x128xf32>
    %259 = vector.extract_strided_slice %242 {offsets = [8, 49], sizes = [1, 128], strides = [1, 1]} : vector<9x192xf32> to vector<1x128xf32>
    %260 = arith.addf %258, %259 : vector<1x128xf32>
    %cst_63 = arith.constant 0.000000e+00 : f32
    %261 = vector.broadcast %cst_63 : f32 to vector<1x128xf32>
    %262 = arith.select %87, %260, %261 : vector<1x128xi1>, vector<1x128xf32>
    %263 = arith.addf %255, %262 : vector<1x128xf32>
    %264 = vector.broadcast %7 : vector<1x1xf32> to vector<1x128xf32>
    %265 = arith.addf %263, %264 : vector<1x128xf32>
    %266 = vector.extract_strided_slice %43 {offsets = [0, 32], sizes = [4, 128], strides = [1, 1]} : vector<4x192xf32> to vector<4x128xf32>
    %267 = vector.broadcast %265 : vector<1x128xf32> to vector<4x128xf32>
    %268 = arith.mulf %266, %267 : vector<4x128xf32>
    %c0_64 = arith.constant 0 : index
    %c0_65 = arith.constant 0 : index
    %269 = vector.load %arg4[%c0_64, %c0_65] : memref<4x9xf32, #tpu.memory_space<vmem>>, vector<4x9xf32>
    %270 = vector.extract_strided_slice %269 {offsets = [0, 0], sizes = [4, 4], strides = [1, 1]} : vector<4x9xf32> to vector<4x4xf32>
    %cst_66 = arith.constant dense<0.000000e+00> : vector<4x128xf32>
    %271 = tpu.matmul %270, %240, %cst_66 {dimension_numbers = #tpu.dot_dimension_numbers<[1], [0], [0], [1], [0, 0, 1, 1], [], []>} : vector<4x4xf32>, vector<4x128xf32>, vector<4x128xf32> -> vector<4x128xf32>
    %272 = vector.extract_strided_slice %269 {offsets = [0, 4], sizes = [4, 4], strides = [1, 1]} : vector<4x9xf32> to vector<4x4xf32>
    %cst_67 = arith.constant dense<0.000000e+00> : vector<4x128xf32>
    %273 = tpu.matmul %272, %268, %cst_67 {dimension_numbers = #tpu.dot_dimension_numbers<[1], [0], [0], [1], [0, 0, 1, 1], [], []>} : vector<4x4xf32>, vector<4x128xf32>, vector<4x128xf32> -> vector<4x128xf32>
    %274 = arith.addf %271, %273 : vector<4x128xf32>
    %275 = vector.extract_strided_slice %269 {offsets = [0, 8], sizes = [4, 1], strides = [1, 1]} : vector<4x9xf32> to vector<4x1xf32>
    %276 = vector.broadcast %275 : vector<4x1xf32> to vector<4x128xf32>
    %277 = arith.addf %274, %276 : vector<4x128xf32>
    %c0_68 = arith.constant 0 : index
    %c0_69 = arith.constant 0 : index
    %c0_70 = arith.constant 0 : index
    %278 = vector.load %arg7[%c0_68, %c0_69, %c0_70] : memref<1x4x128xf32, #tpu.memory_space<vmem>>, vector<1x4x128xf32>
    %279 = vector.shape_cast %278 : vector<1x4x128xf32> to vector<4x128xf32>
    %280 = vector.shape_cast %277 : vector<4x128xf32> to vector<1x4x128xf32>
    tpu.vector_store %arg7[%c0_68, %c0_69, %c0_70], %280 {strides = array<i32>} : memref<1x4x128xf32, #tpu.memory_space<vmem>>, vector<1x4x128xf32>,
    return
  }
  func.func @transform_0(%arg0: i32, %arg1: i32) -> (i32, i32, i32, i32) {
    %c0_i32 = arith.constant 0 : i32
    %c0_i32_0 = arith.constant 0 : i32
    %c0_i32_1 = arith.constant 0 : i32
    return %arg0, %arg1, %c0_i32, %c0_i32_0 : i32, i32, i32, i32
  }
  func.func @transform_1(%arg0: i32, %arg1: i32) -> (i32, i32) {
    %c0_i32 = arith.constant 0 : i32
    %c0_i32_0 = arith.constant 0 : i32
    %c0_i32_1 = arith.constant 0 : i32
    return %c0_i32, %c0_i32_0 : i32, i32
  }
  func.func @transform_2(%arg0: i32, %arg1: i32) -> (i32, i32) {
    %c0_i32 = arith.constant 0 : i32
    %c0_i32_0 = arith.constant 0 : i32
    %c0_i32_1 = arith.constant 0 : i32
    return %c0_i32, %c0_i32_0 : i32, i32
  }
  func.func @transform_3(%arg0: i32, %arg1: i32) -> (i32, i32) {
    %c0_i32 = arith.constant 0 : i32
    %c0_i32_0 = arith.constant 0 : i32
    %c0_i32_1 = arith.constant 0 : i32
    return %c0_i32, %c0_i32_0 : i32, i32
  }
  func.func @transform_4(%arg0: i32, %arg1: i32) -> (i32, i32) {
    %c0_i32 = arith.constant 0 : i32
    %c0_i32_0 = arith.constant 0 : i32
    %c0_i32_1 = arith.constant 0 : i32
    return %c0_i32, %c0_i32_0 : i32, i32
  }
  func.func @transform_5(%arg0: i32, %arg1: i32) -> (i32, i32, i32) {
    %c0_i32 = arith.constant 0 : i32
    %c0_i32_0 = arith.constant 0 : i32
    return %arg0, %c0_i32, %arg1 : i32, i32, i32
  }
}

</mosaic_0001>

<bundles_post_ra>
// kernel: tpu_custom_call.1
= control target key start
LH: loop header
LB: loop body
LE: loop exit
PB: predicated region body
PF: predicated region fallthrough
CT: control target
= control target key end

     0   :  { %10 = vsyncpa [#allocation4], 0  ;;  %s2126_s0 = inlined_call_operand.hbm [shape: f32[2,2,4,192], index: 0, kind: input, shape index: {}]   ;;  %s2127_s1 = inlined_call_operand.vmem [shape: f32[8,5], index: 1, kind: input, shape index: {}]   ;;  %s2128_s2 = inlined_call_operand.vmem [shape: f32[4,9], index: 2, kind: input, shape index: {}]   ;;  %s2129_s3 = inlined_call_operand.vmem [shape: f32[9,4], index: 3, kind: input, shape index: {}]   ;;  %s2130_s4 = inlined_call_operand.vmem [shape: f32[4,29], index: 4, kind: input, shape index: {}]   ;;  %s2131_s5 = inlined_call_operand.hbm [shape: f32[2,4,256], index: 5, kind: output, shape index: {}]  }
   0x1   :  { %12 = vsyncpa [#allocation4 + $0x1], 0 }
   0x2   :  { %13 = vsyncpa [#allocation5], 0 }
   0x3   :  { %15 = vsyncpa [#allocation5 + $0x1], 0  ;;  %s1688_s18 = smov 0   ;;  %s1690_s19 = smov 0  }
   0x4   :  { %s1692_s20 = smov 0   ;;  %s1694_s21 = smov 0  }
   0x5   :  { %s1696_s22 = smov 0   ;;  %s1698_s23 = smov 0  }
   0x6   :  { %s1700_s24 = smov 0   ;;  %s1702_s25 = smov 0  }
   0x7 LB: > { %s1279_s26 = sadd.s32 4294967295, %s1610_s25   ;;  %s1280_s27 = sadd.s32 4294967294, %s1610_s25   ;;  %s1610_s25 = sphi %s1702_s25, %s21_s25   ;;  %s1606_s24 = sphi %s1700_s24, %s2158_s24   ;;  %s1602_s23 = sphi %s1698_s23, %s2157_s23   ;;  %s1598_s22 = sphi %s1696_s22, %s2156_s22   ;;  %s1594_s21 = sphi %s1694_s21, %s2155_s21   ;;  %s1590_s20 = sphi %s1692_s20, %s2154_s20   ;;  %s1586_s19 = sphi %s1690_s19, %s2153_s19   ;;  %s1582_s18 = sphi %s1688_s18, %s2152_s18  }
   0x8   : > { %s30_s28 = sadd.s32 1, %s1602_s23  ;;  %s33_s29 = sadd.s32 1, %s1606_s24 }
   0x9   : > { %p31_p0 = scmp.ge.s32.totalorder %s30_s28, 2  ;;  %s42_s30 = sadd.s32 1, %s1590_s20 }
   0xa   : > { %p49_p1 = scmp.ne.s32.totalorder %s1590_s20, %s1586_s19  ;;  %p50_p2 = scmp.eq.s32.totalorder %s1610_s25, 0 }
   0xb   : > { %s2160_s28 = smov (%p31_p0, %s30_s28), 0  ;;  %s2162_s29 = smov (!%p31_p0, %s33_s29), %s1606_s24 }
   0xc   : > { %2135 = sst [smem:[#allocation9_spill]] %s2160_s28  ;;  %s38_s6 = ssub.s32 %s1602_s23, %s2160_s28 }
   0xd   : > { %p1741_p3 = por %p50_p2, %p49_p1  ;;  %p35_p4 = scmp.ge.s32.totalorder %s2162_s29, 2 }
   0xe   : > { %p55_p5 = scmp.ne.s32.totalorder %s1586_s19, %s1582_s18  ;;  %p56_p6 = scmp.eq.s32.totalorder %s1279_s26, 0 }
   0xf   : > { %p165_p7 = scmp.eq.s32.totalorder %s1279_s26, 3  ;;  %s2164_s29 = smov (%p35_p4, %s2162_s29), 0 }
  0x10   : > { %2137 = sst [smem:[#allocation10_spill]] %s2164_s29  ;;  %p1749_p8 = por %p56_p6, %p55_p5 }
  0x11   : > { %p1753_p9 = por %p165_p7, %p49_p1  ;;  %s37_s10 = ssub.s32 %s1606_s24, %s2164_s29 }
  0x12   : > { %p171_p10 = scmp.eq.s32.totalorder %s1280_s27, 3  ;;  %s39_s11 = sor.u32 %s38_s6, %s37_s10 }
  0x13   : > { %s2139_s9 = scalar_select %p1753_p9, 1, 0 }
  0x14   : > { %p40_p11 = scmp.eq.s32.totalorder %s39_s11, 0  ;;  %p1759_p12 = por %p171_p10, %p55_p5 }
  0x15   : > { %p1335_p13 = scmp.lt.s32.totalorder %s1610_s25, 4  ;;  %s203_s13 = sand.u32 1, %s1590_s20  }
  0x16   : > { %s2140_s12 = scalar_select %p1759_p12, 1, 0 }
  0x17   : > { %s1766_s14 = scalar_select %p40_p11, %s1590_s20, %s42_s30  }
  0x18   : > { %s1283_s15 = sshll.u32 %s203_s13, 3  ;;  %s1284_s16 = sshll.u32 %s1602_s23, 1 }
  0x19   : > { %s1285_s17 = sshll.u32 %s1606_s24, 2  ;;  %s207_s26 = scalar_lea.vmem [#allocation3], %s1283_s15 }
  0x1a   : > { %s217_s28 = sshll.u32 %s207_s26, 4  ;;  %s213_s29 = sadd.s32 %s1285_s17, %s1284_s16  ;;  %s1770_s28 = int_to_ptr.vmem [resolvable:$true] %s217_s28 }
  0x1b   : > { %s1286_s27 = sshll.u32 %s213_s29, 6  ;;  %p1774_p0 = pnand %p1335_p13, %p1741_p3 }
  0x1c   : > { %s1781_s30 = scalar_lea.hbm %s2126_s0, %s1286_s27  ;;  %s204_s15 = scalar_lea.sflag [#allocation4], %s203_s13 }
  0x1d   : > { %s1482_s29 = scalar_lea.hbm %s1781_s30, 128  ;;  %p1484_p3 = pneg %p1774_p0 }
  0x1e   : > { %p1483_p4 = scmp.ne.s32.totalorder %s1781_s30, %s1482_s29  ;;  %s1487_s17 = scalar_lea.hbm %s2126_s0, 512 }
  0x1f   : > { %p1488_p7 = scmp.lt.u32.totalorder %s1781_s30, %s2126_s0  ;;  %p1489_p10 = scmp.lt.u32.totalorder %s1487_s17, %s1482_s29 }
  0x20   : > { %p1485_p5 = pnand %p1484_p3, %p1483_p4  ;;  %p1491_p13 = scmp.lt.u32.totalorder %s1482_s29, %s1781_s30 }
  0x21   : > { %p1490_p11 = por %p1489_p10, %p1488_p7 }
  0x22   : > { %p1486_p6 = pneg %p1485_p5 }
  0x23   : > { %p1492_p1 = por %p1491_p13, %p1490_p11 }
  0x25   : > { %p1493_p2 = pnand %p1492_p1, %p1486_p6 }
  0x27   : > { %1496 = shalt.err (!%p1493_p2)
}
  0x28   : > { %s1497_s13 = scalar_lea.vmem %s1770_s28, 128  ;;  %s1612_s10 = smov [#allocation3]  }
  0x29   : > { %p1498_p4 = scmp.ne.s32.totalorder %s1770_s28, %s1497_s13  ;;  %s1502_s11 = sshll.u32 %s1612_s10, 4  ;;  %s1503_s11 = int_to_ptr.vmem [resolvable:$false] %s1502_s11 }
  0x2a   : > { %s1504_s7 = scalar_lea.vmem %s1503_s11, 256  ;;  %p1505_p9 = scmp.lt.s32.totalorder %s1770_s28, %s1503_s11 }
  0x2b   : > { %p1500_p5 = pnand %p1498_p4, %p1484_p3  ;;  %p1506_p7 = scmp.lt.s32.totalorder %s1504_s7, %s1497_s13 }
  0x2d   : > { %p1501_p12 = pneg %p1500_p5  ;;  %p1507_p10 = por %p1506_p7, %p1505_p9 }
  0x2f   : > { %p1508_p11 = pnand %p1507_p10, %p1501_p12 }
  0x31   : > { %1511 = shalt.err (!%p1508_p11)
}
  0x32   : > { %1330 = dma.hbm_to_vmem [thread:$0]  (!%p1774_p0), %s1781_s30, 128, %s1770_s28, %s204_s15  }
  0x33   : > { %p2142_p1 = scmp.lt.s32.totalorder %s1610_s25, 5  ;;  %p2143_p2 = scmp.ge.s32.totalorder %s1610_s25, 1 }
  0x35   : > { %p223_p3 = pnand %p2143_p2, %p2142_p1 }
  0x36   : > { %s1815_s29 = sand.u32 (!%p223_p3), 1, %s1586_s19  }
  0x37   : > { %226 = sbr.rel (%p223_p3) target bundleno = 1195 (0x4ab), region = 40  ;;  %s1288_s16 = sshll.u32 (!%p223_p3), %s1815_s29, 3 }
  0x38   : > { %s229_s17 = scalar_lea.sflag (!%p223_p3), [#allocation4], %s1815_s29  ;;  %s232_s26 = scalar_lea.vmem (!%p223_p3), [#allocation3], %s1288_s16 }
  0x3e   : > { %1573 = dma.done.wait (%p1749_p8), %s229_s17, 128  }
  0x3f   : > { %1575 = vsyncadd (%p1749_p8), %s229_s17, 4294967168  ;;  %v1613_v0 = vmov 25   ;;  %v1826_v1 = vld [vmem:[%s2130_s4] sm:$0xf]  ;;  %v1614_v2 = vmov 26   ;;  %v1615_v3 = vmov 0.0  }
  0x40   : > { %1445 = vset.pattern.permute.xlu0 %v1613_v0  ;;  %444 = vmatprep.mubr.f32.mxu0 %v1615_v3  ;;  %v1835_v4 = vld [vmem:[%s2127_s1] sm:$0xff]  ;;  %v1616_v5 = vmov 4   ;;  %v1617_v6 = vmov 5   ;;  %v1618_v7 = vmov 10   ;;  %v1841_v8 = vld [vmem:[%s232_s26] sm:$0xff]  ;;  %v1619_v9 = vmov 6  }
  0x41   : > { %319 = vperm.xlu0 %1445, %v1826_v1   ;;  %906 = vmatprep.mubr.f32.mxu1 %v1615_v3  ;;  %v1620_v10 = vmov 16   ;;  %v262_v11 = vcombine.high %v1841_v8, %v1841_v8  ;;  %vm264_vm0 = vcmask 1043456   ;;  %vm272_vm1 = vcmask 519168   ;;  %s1290_s15 = sshll.u32 %s1594_s21, 3  ;;  %s1642_s28 = smov 112  }
  0x42   : > { %1447 = vset.pattern.permute.xlu1 %v1616_v5  ;;  %v265_v12 = vsel %vm264_vm0, %v1841_v8, 0.0  ;;  %v1621_v14 = vmov 11   ;;  %v1622_v15 = vmov 21   ;;  %v1623_v18 = vmov 15   ;;  %s346_s27 = ssub.s32 2, %s1290_s15  ;;  %s348_s13 = ssub.s32 18, %s1290_s15 }
  0x43   : > { %370 = vperm.xlu1 %1447, %v1835_v4   ;;  %v273_v13 = vsel %vm272_vm1, %v262_v11, 0.0  ;;  %v266_v16 = vrot.slane %v265_v12, 4  ;;  %v1624_v19 = vmov 18   ;;  %v1625_v22 = vmov 8   ;;  %s1291_s10 = sshll.u32 %s346_s27, 4  ;;  %s1292_s11 = sshll.u32 %s348_s13, 4 }
  0x44   : > { %v274_v17 = vrot.slane %v273_v13, 4  ;;  %v1626_v23 = vmov 19   ;;  %v1627_v28 = vmov 20   ;;  %v1628_v29 = vmov 1   ;;  %s1643_s6 = smov 96   ;;  %s1644_s8 = smov 80  }
  0x45   : > { %1446 = vset.pattern.permute.xlu0 %v1614_v2  ;;  %v267_v20 = vadd.f32 %v266_v16, %v265_v12  ;;  %v1629_v32 = vmov 13   ;;  %v1630_v33 = vmov 12   ;;  %v1631_v36 = vmov 9   ;;  %s1645_s30 = smov 64   ;;  %s1648_s15 = smov 113  }
  0x46   : > { %331 = vperm.xlu0 %1446, %v1826_v1   ;;  %v275_v21 = vadd.f32 %v274_v17, %v273_v13  ;;  %v1632_v39 = vmov 14   ;;  %v1633_v42 = vmov 23   ;;  %v1634_v44 = vmov 24   ;;  %s1649_s27 = smov 111   ;;  %s1650_s13 = smov 2  }
  0x47   : > { %1448 = vset.pattern.permute.xlu1 %v1617_v6  ;;  %v268_v24 = vrot.slane %v267_v20, 2  ;;  %v1635_v46 = vmov 0   ;;  %v1636_v51 = vmov 7   ;;  %v1637_v54 = vmov 3   ;;  %s1653_s7 = smov 126   ;;  %s1654_s16 = smov 32  }
  0x48   : > { %496 = vperm.xlu1 %1448, %v1826_v1   ;;  %v276_v25 = vrot.slane %v275_v21, 2  ;;  %v1638_v57 = vmov 17   ;;  %v1639_v61 = vmov 22   ;;  %vm373_vm8 = vcmask 31744   ;;  %p2148_p9 = scmp.ne.s32.totalorder %s2139_s9, 0 }
  0x49   : > { %v269_v26 = vadd.f32 %v268_v24, %v267_v20  ;;  %v353_v24 = vstv %s1292_s11  ;;  %vm479_vm9 = vcmask 536064   ;;  %vm477_vm10 = vcmask 1044464   ;;  %s1652_s11 = smov 127  }
  0x4a   : > { %1450 = vset.pattern.permute.xlu0 %v1618_v7  ;;  %v277_v27 = vadd.f32 %v276_v25, %v275_v21  ;;  %480 = vst.msk [vmem:[#allocation2 + $0x8] sm:$0xf] %vm479_vm9, %v1615_v3  ;;  %vm485_vm11 = vcmask 523268   ;;  %vm504_vm13 = vcmask 916480   ;;  %vm517_vm14 = vcmask 785408  }
  0x4b   : > { %509 = vperm.xlu0 %1450, %v1826_v1   ;;  %v270_v30 = vrot.slane %v269_v26, 1  ;;  %478 = vst.msk [vmem:[#allocation2] sm:$0xf] %vm477_vm10, %v1615_v3  ;;  %vm486_vm12 = vmor %vm485_vm11, %vm264_vm0  ;;  %vm530_vm15 = vcmask 654336   ;;  %vm744_vm10 = vcmask 1039360   ;;  %vm811_vm11 = vcmask 1031168  }
  0x4c   : > { %1449 = vset.pattern.permute.xlu1 %v1619_v9  ;;  %v278_v31 = vrot.slane %v277_v27, 1 }
  0x4d   : > { %567 = vperm.xlu1 %1449, %v1826_v1   ;;  %v271_v34 = vadd.f32 %v270_v30, %v269_v26 }
  0x4e   : > { %v279_v35 = vadd.f32 %v278_v31, %v277_v27 }
  0x4f   : > { %1453 = vset.pattern.permute.xlu0 %v1620_v10  ;;  %v281_v37 = vmul.f32 0.25, %v271_v34  ;;  %v324_v10 = vlaneseq }
  0x50   : > { %591 = vperm.xlu0 %1453, %v1826_v1   ;;  %v282_v38 = vmul.f32 0.25, %v279_v35  ;;  %v829_v35 = vld [vmem:[%s2129_s3 + $0x8] sm:$0x1] }
  0x51   : > { %1451 = vset.pattern.permute.xlu1 %v1621_v14  ;;  %v1876_v13 = vshrl.u32 %v324_v10, 7  ;;  %v1880_v16 = vand.u32 127, %v324_v10 }
  0x52   : > { %579 = vperm.xlu1 %1451, %v1826_v1   ;;  %v285_v40 = vcombine.low %v281_v37, %v282_v38 }
  0x53   : > { %v344_v21 = vadd.s32 128, %v1880_v16  ;;  %vm354_vm5 = vcmp.lt.s32.totalorder %v1880_v16, %v353_v24 }
  0x54   : > { %1456 = vset.pattern.permute.xlu0 %v1622_v15  ;;  %v287_v41 = vsub.f32 %v1841_v8, %v285_v40  ;;  %v1640_v8 = vmov 839922192  }
  0x55   : > { %603 = vperm.xlu0 %1456, %v1826_v1   ;;  %v322_v9 = vunpack.c.l.s4 %v1640_v8  ;;  %vm355_vm3 = vcmp.lt.s32.totalorder %v344_v21, %v353_v24 }
  0x56   : > { %1452 = vset.pattern.permute.xlu1 %v1623_v18  ;;  %v288_v43 = vmul.f32 %v287_v41, %v287_v41 }
  0x57   : > { %522 = vperm.xlu1 %1452, %v1826_v1   ;;  %v323_v12 = vunpack.c.0.s8 %v322_v9 }
  0x58   : > { %v290_v45 = vcombine.high %v288_v43, %v288_v43  ;;  %v292_v47 = vsel %vm264_vm0, %v288_v43, 0.0 }
  0x59   : > { %1459 = vset.pattern.permute.xlu0 %v1624_v19  ;;  %v293_v49 = vrot.slane %v292_v47, 4  ;;  %v326_v15 = vsub.s32 %v323_v12, %v1876_v13 }
  0x5a   : > { %713 = vperm.xlu0 %1459, %v1826_v1   ;;  %v299_v48 = vsel %vm272_vm1, %v290_v45, 0.0  ;;  %vm543_vm1 = vcmask 523264  }
  0x5b   : > { %1454 = vset.pattern.permute.xlu1 %v1625_v22  ;;  %v300_v50 = vrot.slane %v299_v48, 4  ;;  %v294_v52 = vadd.f32 %v293_v49, %v292_v47 }
  0x5c   : > { %689 = vperm.xlu1 %1454, %v1826_v1  }
  0x5d   : > { %v301_v53 = vadd.f32 %v300_v50, %v299_v48  ;;  %v295_v55 = vrot.slane %v294_v52, 2 }
  0x5e   : > { %1462 = vset.pattern.permute.xlu0 %v1626_v23  ;;  %v350_v23 = vstv %s1291_s10  ;;  %s1651_s10 = smov 1  }
  0x5f   : > { %780 = vperm.xlu0 %1462, %v1826_v1   ;;  %v302_v56 = vrot.slane %v301_v53, 2  ;;  %v296_v58 = vadd.f32 %v295_v55, %v294_v52  ;;  %vm352_vm2 = vcmp.ge.s32.totalorder %v344_v21, %v350_v23  ;;  %vm351_vm4 = vcmp.ge.s32.totalorder %v1880_v16, %v350_v23 }
  0x60   : > { %1455 = vset.pattern.permute.xlu1 %v1627_v28  ;;  %vm1885_vm6 = vmand %vm352_vm2, %vm355_vm3  ;;  %vm949_vm2 = vcmask 924672  }
  0x61   : > { %535 = vperm.xlu1 %1455, %v1826_v1   ;;  %v303_v59 = vadd.f32 %v302_v56, %v301_v53  ;;  %v297_v60 = vrot.slane %v296_v58, 1  ;;  %vm1889_vm7 = vmand %vm351_vm4, %vm354_vm5  ;;  %vm983_vm4 = vcmask 908288  }
  0x63   : > { %1465 = vset.pattern.permute.xlu0 %v1628_v29  ;;  %v304_v62 = vrot.slane %v303_v59, 1  ;;  %v298_v63 = vadd.f32 %v297_v60, %v296_v58 }
  0x64   : > { %561 = vperm.xlu0 %1465, %v1826_v1  }
  0x65   : > { %1457 = vset.pattern.permute.xlu1 %v1629_v32  ;;  %v305_v0 = vadd.f32 %v304_v62, %v303_v59  ;;  %v306_v2 = vmul.f32 0.25, %v298_v63 }
  0x66   : > { %701 = vperm.xlu1 %1457, %v1826_v1  }
  0x67   : > { %v308_v6 = vadd.f32 1e-06, %v306_v2 }
  0x68   : > { %1468 = vset.pattern.permute.xlu0 %v1630_v33  ;;  %v828_v33 = vld [vmem:[%s2129_s3] sm:$0xff] }
  0x69   : > { %647 = vperm.xlu0 %1468, %v1826_v1   ;;  %1478 = vrsqrt.f32 %v308_v6 }
  0x6a   : > { %1458 = vset.pattern.permute.xlu1 %v1631_v36 }
  0x6b   : > { %756 = vperm.xlu1 %1458, %v1826_v1  }
  0x6d   : > { %1469 = vset.pattern.permute.xlu0 %v1616_v5  ;;  %v307_v5 = vmul.f32 0.25, %v305_v0 }
  0x6e   : > { %751 = vperm.xlu0 %1469, %v1826_v1  }
  0x6f   : > { %1460 = vset.pattern.permute.xlu1 %v1632_v39  ;;  %v309_v7 = vadd.f32 1e-06, %v307_v5 }
  0x70   : > { %768 = vperm.xlu1 %1460, %v1826_v1  }
  0x71   : > { %1480 = vrsqrt.f32 %v309_v7 }
  0x73   : > { %v1479_v11 = vpop.eup %1478 }
  0x74   : > { %1461 = vset.pattern.permute.xlu1 %v1633_v42 }
  0x75   : > { %725 = vperm.xlu1 %1461, %v1826_v1  }
  0x79   : > { %1463 = vset.pattern.permute.xlu1 %v1634_v44 }
  0x7a   : > { %792 = vperm.xlu1 %1463, %v1826_v1  }
  0x7b   : > { %v1481_v14 = vpop.eup %1480 }
  0x7c   : > { %v314_v17 = vcombine.low %v1479_v11, %v1481_v14 }
  0x7e   : > { %1464 = vset.pattern.permute.xlu1 %v1635_v46  ;;  %v316_v19 = vmul.f32 %v314_v17, %v287_v41 }
  0x7f   : > { %490 = vperm.xlu1 %1464, %v1826_v1  }
  0x83   : > { %1466 = vset.pattern.permute.xlu1 %v1636_v51 }
  0x84   : > { %635 = vperm.xlu1 %1466, %v1826_v1  }
  0x88   : > { %1467 = vset.pattern.permute.xlu1 %v1637_v54 }
  0x89   : > { %684 = vperm.xlu1 %1467, %v1826_v1  }
  0x8d   : > { %1470 = vset.pattern.permute.xlu1 %v1638_v57 }
  0x8e   : > { %659 = vperm.xlu1 %1470, %v1826_v1  }
  0x92   : > { %1471 = vset.pattern.permute.xlu1 %v1639_v61 }
  0x93   : > { %671 = vperm.xlu1 %1471, %v1826_v1  }
  0x97   : > { %1475 = vset.pattern.permute.xlu1 %v1625_v22 }
  0xc0   : > { %v320_v18 = vpop.permute.xlu0 %319 }
  0xc1   : > { %v327_v20 = vrot.slane %v320_v18, %v326_v15 }
  0xc2   : > { %v371_v36 = vpop.permute.xlu1 %370 }
  0xc3   : > { %v329_v26 = vmul.f32 %v327_v20, %v316_v19 }
  0xc5   : > { %v332_v25 = vpop.permute.xlu0 %331 }
  0xc6   : > { %v339_v27 = vrot.slane %v332_v25, %v326_v15 }
  0xc7   : > { %v497_v37 = vpop.permute.xlu1 %496 }
  0xc8   : > { %v341_v28 = vadd.f32 %v339_v27, %v329_v26 }
  0xca   : > { %v363_v30 = vcombine.high %v341_v28, %v341_v28  ;;  %v1906_v34 = vsel %vm1889_vm7, %v341_v28, 0.0  ;;  %v510_v61 = vpop.permute.xlu0 %509 }
  0xcc   : > { %1293 = vmatprep.subr.msk.mxu0 %vm264_vm0, %v363_v30  ;;  %v1896_v32 = vsel %vm1885_vm6, %v363_v30, 0.0  ;;  %v568_v38 = vpop.permute.xlu1 %567 }
  0xcd   : > { %1294 = vmatpush1.msk.msra.mxu0 %vm264_vm0, %v341_v28  ;;  %1296 = vmatprep.subr.msk.mxu1 %vm264_vm0, %v1896_v32 }
  0xce   : > { %1295 = vmatmul.mubr.msk.f32.vlgmr.msra.gmra.mrb[0].mxu0 %vm373_vm8, %v1835_v4  ;;  %1297 = vmatpush1.msk.msra.mxu1 %vm264_vm0, %v1906_v34  ;;  %v1641_v4 = vmov 2  }
  0xcf   : > { %1298 = vmatmul.mubr.msk.f32.vlgmr.msra.gmra.mrb[0].mxu1 %vm373_vm8, %v828_v33  ;;  %1313 = vmatprep.subr.mxu0 %v1615_v3  ;;  %v592_v6 = vpop.permute.xlu0 %591 }
  0xd0   : > { %912 = vmatprep.mubr.f32.mxu1 %v1615_v3  ;;  %1472 = vset.pattern.permute.xlu0 %v1641_v4 }
  0xd1   : > { %v580_v39 = vpop.permute.xlu1 %579 }
  0xd3   : > { %1299 = vmatmul.mubr.msk.f32.gmra.mrb[2].mxu1 %vm373_vm8, %v829_v35  ;;  %v1646_v35 = vmov 28  }
  0xd4   : > { %v604_v10 = vpop.permute.xlu0 %603 }
  0xd6   : > { %v523_v40 = vpop.permute.xlu1 %522 }
  0xd9   : > { %v714_v18 = vpop.permute.xlu0 %713 }
  0xdb   : > { %v690_v41 = vpop.permute.xlu1 %689 }
  0xde   : > { %v781_v23 = vpop.permute.xlu0 %780 }
  0xe0   : > { %v536_v46 = vpop.permute.xlu1 %535 }
  0xe3   : > { %v562_v33 = vpop.permute.xlu0 %561 }
  0xe5   : > { %v702_v58 = vpop.permute.xlu1 %701 }
  0xea   : > { %v757_v59 = vpop.permute.xlu1 %756 }
  0xef   : > { %v769_v0 = vpop.permute.xlu1 %768 }
  0xf4   : > { %v726_v9 = vpop.permute.xlu1 %725 }
  0xf9   : > { %v793_v14 = vpop.permute.xlu1 %792 }
  0xfe   : > { %v1968_v21 = vpop.permute.xlu1 %490 }
 0x103   : > { %v636_v27 = vpop.permute.xlu1 %635 }
 0x108   : > { %v1980_v30 = vpop.permute.xlu1 %684 }
 0x10d   : > { %v660_v4 = vpop.permute.xlu1 %659 }
 0x1a1   : > { %v446_v42 = vpop.f32.mrb[0].mxu0 }
 0x1a2   : > { %v1921_v43 = vadd.f32 %v446_v42, %v371_v36  ;;  %v448_v44 = vpop.f32.mrb[1].mxu0  ;;  %v1923_v45 = vpop.f32.mrb[0].mxu1 }
 0x1a3   : > { %v1925_v47 = vadd.f32 %v448_v44, %v371_v36  ;;  %v921_v48 = vrot.slane %v1923_v45, 3  ;;  %v1928_v49 = vpop.f32.mrb[1].mxu1  ;;  %v932_v53 = vrot.slane %v1923_v45, 6 }
 0x1a4   : > { %v451_v50 = vsel %vm1889_vm7, %v1921_v43, 0.0  ;;  %v922_v51 = vrot.slane %v1928_v49, 3  ;;  %v933_v55 = vrot.slane %v1928_v49, 6  ;;  %vm622_vm7 = vcmask 7168  }
 0x1a5   : > { %v452_v52 = vsel %vm1885_vm6, %v1925_v47, 0.0  ;;  %923 = vrot.lane.b32.xlu1 %v921_v48, %s1642_s28  ;;  %vm555_vm6 = vcmask 15360  }
 0x1a6   : > { %v483_v54 = vcombine.low %v451_v50, %v452_v52  ;;  %925 = vrot.lane.b32.xlu0 %v922_v51, %s1642_s28  ;;  %v914_v56 = vpop.f32.mrb[2].mxu1 }
 0x1a7   : > { %v916_v57 = vpop.f32.mrb[3].mxu1  ;;  %v964_v26 = vrot.slane %v914_v56, 6 }
 0x1a8   : > { %487 = vst.msk [vmem:[#allocation2 + $0x4] sm:$0xff] %vm486_vm12, %v483_v54  ;;  %v965_v31 = vrot.slane %v916_v57, 6 }
 0x1a9   : > { %934 = vrot.lane.b32.xlu1 %v932_v53, %s1643_s6 }
 0x1aa   : > { %936 = vrot.lane.b32.xlu0 %v933_v55, %s1643_s6 }
 0x1af   : > { %v1944_v60 = vld [vmem:[#allocation2 + $0x4] sm:$0xff] }
 0x1b0   : > { %v499_v62 = vmul.f32 %v1944_v60, %v497_v37  ;;  %v582_v63 = vmul.f32 %v1944_v60, %v580_v39  ;;  %v570_v2 = vmul.f32 %v1944_v60, %v568_v38  ;;  %v525_v5 = vmul.f32 %v1944_v60, %v523_v40  ;;  %v648_v37 = vpop.permute.xlu0 %647  ;;  %v672_v40 = vpop.permute.xlu1 %671 }
 0x1b1   : > { %v512_v7 = vmul.f32 %v1944_v60, %v510_v61  ;;  %v692_v8 = vmul.f32 %v690_v41, %v1944_v60  ;;  %v594_v11 = vmul.f32 %v1944_v60, %v592_v6  ;;  %v606_v12 = vmul.f32 %v1944_v60, %v604_v10 }
 0x1b2   : > { %501 = vrot.lane.b32.xlu1 %v499_v62, %s1642_s28  ;;  %584 = vrot.lane.b32.xlu0 %v582_v63, %s1643_s6  ;;  %v538_v15 = vmul.f32 %v1944_v60, %v536_v46  ;;  %v759_v17 = vmul.f32 %v757_v59, %v1944_v60  ;;  %v704_v19 = vmul.f32 %v702_v58, %v1944_v60  ;;  %v1647_v38 = vmov 27  }
 0x1b3   : > { %v771_v20 = vmul.f32 %v769_v0, %v1944_v60  ;;  %v783_v24 = vmul.f32 %v781_v23, %v1944_v60  ;;  %v716_v25 = vmul.f32 %v714_v18, %v1944_v60  ;;  %v728_v28 = vmul.f32 %v726_v9, %v1944_v60 }
 0x1b4   : > { %v795_v29 = vmul.f32 %v793_v14, %v1944_v60  ;;  %v638_v36 = vmul.f32 %v636_v27, %v1944_v60  ;;  %v650_v39 = vmul.f32 %v648_v37, %v1944_v60  ;;  %v662_v41 = vmul.f32 %v660_v4, %v1944_v60  ;;  %v1996_v44 = vpop.permute.xlu0 %751 }
 0x1b5   : > { %v674_v42 = vmul.f32 %v672_v40, %v1944_v60 }
 0x1b6   : > { %572 = vrot.lane.b32.xlu1 %v570_v2, %s1642_s28  ;;  %527 = vrot.lane.b32.xlu0 %v525_v5, %s1644_s8 }
 0x1ba   : > { %514 = vrot.lane.b32.xlu1 %v512_v7, %s1643_s6  ;;  %694 = vrot.lane.b32.xlu0 %v692_v8, %s1642_s28 }
 0x1be   : > { %596 = vrot.lane.b32.xlu1 %v594_v11, %s1644_s8  ;;  %608 = vrot.lane.b32.xlu0 %v606_v12, %s1645_s30  ;;  %v559_v11 = vld [vmem:[#allocation2] sm:$0xff] }
 0x1c2   : > { %540 = vrot.lane.b32.xlu1 %v538_v15, %s1645_s30  ;;  %761 = vrot.lane.b32.xlu0 %v759_v17, %s1642_s28  ;;  %v493_v17 = vmul.f32 %v559_v11, %v1968_v21 }
 0x1c6   : > { %706 = vrot.lane.b32.xlu1 %v704_v19, %s1643_s6  ;;  %773 = vrot.lane.b32.xlu0 %v771_v20, %s1643_s6  ;;  %v564_v19 = vmul.f32 %v562_v33, %v559_v11 }
 0x1ca   : > { %718 = vrot.lane.b32.xlu1 %v716_v25, %s1644_s8  ;;  %785 = vrot.lane.b32.xlu0 %v783_v24, %s1644_s8 }
 0x1ce   : > { %730 = vrot.lane.b32.xlu1 %v728_v28, %s1645_s30  ;;  %966 = vrot.lane.b32.xlu0 %v964_v26, %s1643_s6 }
 0x1d2   : > { %797 = vrot.lane.b32.xlu1 %v795_v29, %s1645_s30  ;;  %629 = vperm.xlu0 %1472, %v1826_v1  }
 0x1d6   : > { %1473 = vset.pattern.permute.xlu0 %v1646_v35  ;;  %968 = vrot.lane.b32.xlu1 %v965_v31, %s1643_s6 }
 0x1d7   : > { %989 = vperm.xlu0 %1473, %v1826_v1  }
 0x1da   : > { %640 = vrot.lane.b32.xlu1 %v638_v36, %s1642_s28 }
 0x1db   : > { %1474 = vset.pattern.permute.xlu0 %v1647_v38 }
 0x1dc   : > { %817 = vperm.xlu0 %1474, %v1826_v1  }
 0x1de   : > { %652 = vrot.lane.b32.xlu1 %v650_v39, %s1643_s6 }
 0x1e0   : > { %664 = vrot.lane.b32.xlu0 %v662_v41, %s1644_s8  ;;  %s1305_s8 = sshll.u32 %s1598_s22, 1 }
 0x1e1   : > { %1476 = vset.pattern.permute.xlu0 %v1625_v22 }
 0x1e2   : > { %676 = vrot.lane.b32.xlu1 %v674_v42, %s1645_s30  ;;  %s1189_s30 = sadd.s32 %s1594_s21, %s1305_s8  ;;  %s1178_s21 = scalar_lea.sflag [#allocation5], %s1815_s29 }
 0x217   : > { %v924_v46 = vpop.permute.xlu1 %923 }
 0x218   : > { %v926_v48 = vpop.permute.xlu0 %925 }
 0x219   : > { %v1999_v1 = vadd.f32 %v926_v48, %v1928_v49  ;;  %v927_v51 = vsel %vm504_vm13, %v924_v46, %v926_v48 }
 0x21a   : > { %v930_v22 = vadd.f32 %v927_v51, %v1923_v45 }
 0x21b   : > { %v935_v50 = vpop.permute.xlu1 %934 }
 0x21c   : > { %v937_v52 = vpop.permute.xlu0 %936 }
 0x21d   : > { %v942_v53 = vadd.f32 %v937_v52, %v1999_v1  ;;  %v938_v54 = vsel %vm517_vm14, %v935_v50, %v937_v52 }
 0x21e   : > { %v941_v55 = vadd.f32 %v938_v54, %v930_v22 }
 0x21f   : > { %947 = vrot.lane.b32.xlu1 %v942_v53, %s1648_s15  ;;  %v954_v56 = vrot.slane %v942_v53, 1 }
 0x220   : > { %v953_v49 = vrot.slane %v941_v55, 1 }
 0x223   : > { %945 = vrot.lane.b32.xlu1 %v941_v55, %s1648_s15  ;;  %v687_v55 = vmul.f32 %v1980_v30, %v1944_v60  ;;  %v754_v30 = vmul.f32 %v1996_v44, %v1944_v60  ;;  %s1306_s15 = sshll.u32 %s1189_s30, 6 }
 0x224   : > { %v502_v57 = vpop.permute.xlu1 %501  ;;  %v585_v58 = vpop.permute.xlu0 %584 }
 0x225   : > { %v503_v7 = vrot.slane %v502_v57, 4  ;;  %v586_v25 = vrot.slane %v585_v58, 4 }
 0x227   : > { %957 = vrot.lane.b32.xlu1 %v954_v56, %s1642_s28  ;;  %v505_v14 = vsel %vm504_vm13, %v503_v7, %v502_v57  ;;  %v587_v37 = vsel %vm517_vm14, %v586_v25, %v585_v58 }
 0x228   : > { %v573_v59 = vpop.permute.xlu1 %572  ;;  %v528_v61 = vpop.permute.xlu0 %527  ;;  %v507_v24 = vadd.f32 %v505_v14, %v493_v17 }
 0x229   : > { %v574_v10 = vrot.slane %v573_v59, 4  ;;  %v529_v26 = vrot.slane %v528_v61, 4 }
 0x22b   : > { %955 = vrot.lane.b32.xlu1 %v953_v49, %s1642_s28  ;;  %v575_v18 = vsel %vm504_vm13, %v574_v10, %v573_v59  ;;  %v531_v21 = vsel %vm530_vm15, %v529_v26, %v528_v61  ;;  %s1655_s28 = smov 124  }
 0x22c   : > { %v515_v62 = vpop.permute.xlu1 %514  ;;  %v695_v63 = vpop.permute.xlu0 %694  ;;  %v577_v27 = vadd.f32 %v575_v18, %v564_v19 }
 0x22d   : > { %v516_v12 = vrot.slane %v515_v62, 4  ;;  %v696_v4 = vrot.slane %v695_v63, 4 }
 0x22e   : > { %v589_v33 = vadd.f32 %v587_v37, %v577_v27 }
 0x22f   : > { %v518_v20 = vsel %vm517_vm14, %v516_v12, %v515_v62  ;;  %v697_v42 = vsel %vm504_vm13, %v695_v63, %v696_v4 }
 0x230   : > { %v597_v0 = vpop.permute.xlu1 %596  ;;  %v609_v2 = vpop.permute.xlu0 %608  ;;  %v520_v35 = vadd.f32 %v518_v20, %v507_v24  ;;  %v699_v63 = vadd.f32 %v697_v42, %v687_v55 }
 0x231   : > { %v598_v28 = vrot.slane %v597_v0, 4  ;;  %v610_v51 = vrot.slane %v609_v2, 4 }
 0x232   : > { %v533_v46 = vadd.f32 %v531_v21, %v520_v35 }
 0x233   : > { %v599_v38 = vsel %vm530_vm15, %v598_v28, %v597_v0  ;;  %v627_v28 = vld [vmem:[#allocation2 + $0x4] sm:$0xf] }
 0x234   : > { %v541_v5 = vpop.permute.xlu1 %540  ;;  %v762_v45 = vpop.permute.xlu0 %761  ;;  %v601_v56 = vadd.f32 %v599_v38, %v589_v33 }
 0x235   : > { %v542_v29 = vrot.slane %v541_v5, 4  ;;  %v763_v52 = vrot.slane %v762_v45, 4 }
 0x237   : > { %v544_v39 = vsel %vm543_vm1, %v542_v29, %v541_v5  ;;  %v764_v0 = vsel %vm504_vm13, %v762_v45, %v763_v52 }
 0x238   : > { %v707_v6 = vpop.permute.xlu1 %706  ;;  %v774_v8 = vpop.permute.xlu0 %773  ;;  %v546_v57 = vadd.f32 %v544_v39, %v533_v46  ;;  %v766_v17 = vadd.f32 %v764_v0, %v754_v30 }
 0x239   : > { %v708_v40 = vrot.slane %v707_v6, 4  ;;  %v775_v59 = vrot.slane %v774_v8, 4 }
 0x23b   : > { %v709_v49 = vsel %vm517_vm14, %v707_v6, %v708_v40  ;;  %v550_v6 = vcombine.high %v546_v57, %v546_v57  ;;  %v776_v11 = vsel %vm517_vm14, %v774_v8, %v775_v59 }
 0x23c   : > { %v719_v9 = vpop.permute.xlu1 %718  ;;  %v786_v23 = vpop.permute.xlu0 %785  ;;  %v711_v10 = vadd.f32 %v709_v49, %v699_v63  ;;  %v778_v19 = vadd.f32 %v776_v11, %v766_v17 }
 0x23d   : > { %v720_v53 = vrot.slane %v719_v9, 4  ;;  %v787_v5 = vrot.slane %v786_v23, 4 }
 0x23f   : > { %v788_v45 = vsel %vm530_vm15, %v786_v23, %v787_v5 }
 0x240   : > { %v731_v15 = vpop.permute.xlu1 %730  ;;  %v967_v36 = vpop.permute.xlu0 %966  ;;  %v790_v24 = vadd.f32 %v788_v45, %v778_v19 }
 0x241   : > { %v732_v61 = vrot.slane %v731_v15, 4 }
 0x243   : > { %v733_v12 = vsel %vm543_vm1, %v731_v15, %v732_v61 }
 0x244   : > { %v798_v31 = vpop.permute.xlu1 %797 }
 0x245   : > { %v799_v14 = vrot.slane %v798_v31, 4 }
 0x247   : > { %v800_v44 = vsel %vm543_vm1, %v798_v31, %v799_v14 }
 0x248   : > { %v969_v41 = vpop.permute.xlu1 %968  ;;  %v802_v15 = vadd.f32 %v800_v44, %v790_v24 }
 0x249   : > { %v970_v48 = vsel %vm517_vm14, %v967_v36, %v969_v41  ;;  %v974_v50 = vadd.f32 %v969_v41, %v1999_v1  ;;  %v611_v1 = vsel %vm543_vm1, %v610_v51, %v609_v2 }
 0x24a   : > { %v973_v54 = vadd.f32 %v970_v48, %v930_v22  ;;  %v721_v22 = vsel %vm530_vm15, %v719_v9, %v720_v53  ;;  %v613_v7 = vadd.f32 %v611_v1, %v601_v56  ;;  %v806_v35 = vcombine.high %v802_v15, %v802_v15 }
 0x24b   : > { %v978_v58 = vrot.slane %v974_v50, 2  ;;  %v723_v18 = vadd.f32 %v721_v22, %v711_v10  ;;  %v457_v53 = vand.u32 15, %v1880_v16  ;;  %v995_v16 = vsub.s32 0, %v1876_v13  ;;  %v1003_v13 = vld [vmem:[%s2128_s2] sm:$0xf] }
 0x24c   : > { %v977_v62 = vrot.slane %v973_v54, 2  ;;  %v641_v2 = vpop.permute.xlu1 %640  ;;  %v617_v60 = vcombine.high %v613_v7, %v613_v7 }
 0x24d   : > { %981 = vrot.lane.b32.xlu1 %v978_v58, %s1649_s27  ;;  %v735_v20 = vadd.f32 %v733_v12, %v723_v18  ;;  %v642_v27 = vrot.slane %v641_v2, 4  ;;  %vm468_vm3 = vcmp.ge.s32.totalorder %v457_v53, 1  ;;  %vm472_vm5 = vcmp.lt.s32.totalorder %v457_v53, 15 }
 0x24e   : > { %979 = vrot.lane.b32.xlu0 %v977_v62, %s1649_s27  ;;  %vm465_vm9 = vcmp.ge.s32.totalorder %v457_v53, 2  ;;  %vm475_vm12 = vcmp.lt.s32.totalorder %v457_v53, 14 }
 0x24f   : > { %v739_v26 = vcombine.high %v735_v20, %v735_v20  ;;  %v643_v4 = vsel %vm504_vm13, %v641_v2, %v642_v27 }
 0x250   : > { %v653_v25 = vpop.permute.xlu1 %652 }
 0x251   : > { %553 = vrot.lane.b32.xlu1 %v550_v6, %s1650_s13  ;;  %v630_v9 = vpop.permute.xlu0 %629  ;;  %v654_v31 = vrot.slane %v653_v25, 4 }
 0x252   : > { %551 = vrot.lane.b32.xlu0 %v546_v57, %s1650_s13  ;;  %v632_v29 = vmul.f32 %v630_v9, %v627_v28 }
 0x253   : > { %v655_v33 = vsel %vm517_vm14, %v653_v25, %v654_v31 }
 0x254   : > { %v645_v36 = vadd.f32 %v643_v4, %v632_v29  ;;  %v677_v37 = vpop.permute.xlu1 %676 }
 0x255   : > { %620 = vrot.lane.b32.xlu1 %v617_v60, %s1651_s10  ;;  %v678_v38 = vrot.slane %v677_v37, 4 }
 0x256   : > { %618 = vrot.lane.b32.xlu0 %v613_v7, %s1651_s10  ;;  %v990_v8 = vpop.permute.xlu0 %989  ;;  %v657_v40 = vadd.f32 %v655_v33, %v645_v36 }
 0x257   : > { %v679_v46 = vsel %vm543_vm1, %v677_v37, %v678_v38 }
 0x259   : > { %742 = vrot.lane.b32.xlu1 %v739_v26, %s1652_s11 }
 0x25a   : > { %740 = vrot.lane.b32.xlu0 %v735_v20, %s1652_s11 }
 0x25b   : > { %v2030_v23 = vpop.permute.xlu0 %817 }
 0x25d   : > { %809 = vrot.lane.b32.xlu1 %v806_v35, %s1653_s7 }
 0x25e   : > { %807 = vrot.lane.b32.xlu0 %v802_v15, %s1653_s7  ;;  %s2072_s7 = scalar_lea.hbm %s2131_s5, %s1306_s15 }
 0x25f   : > { %v665_v21 = vpop.permute.xlu0 %664 }
 0x260   : > { %v666_v39 = vrot.slane %v665_v21, 4 }
 0x262   : > { %v667_v41 = vsel %vm530_vm15, %v665_v21, %v666_v39 }
 0x263   : > { %v669_v42 = vadd.f32 %v667_v41, %v657_v40 }
 0x265   : > { %v681_v48 = vadd.f32 %v679_v46, %v669_v42 }
 0x291   : > { %v948_v50 = vpop.permute.xlu1 %947 }
 0x295   : > { %v946_v51 = vpop.permute.xlu1 %945 }
 0x296   : > { %v950_v55 = vsel %vm949_vm2, %v946_v51, %v948_v50 }
 0x297   : > { %v952_v58 = vsel %vm468_vm3, %v950_v55, 0.0 }
 0x299   : > { %v958_v52 = vpop.permute.xlu1 %957 }
 0x29d   : > { %v956_v54 = vpop.permute.xlu1 %955 }
 0x29e   : > { %v959_v56 = vsel %vm504_vm13, %v956_v54, %v958_v52  ;;  %vm1656_vm13 = vmmov 0  }
 0x29f   : > { %v961_v59 = vadd.f32 %v959_v56, %v952_v58  ;;  %1315 = vmatprep.mubr.msk.f32.mxu0 %vm1656_vm13, %v1615_v3 }
 0x2bf   : > { %v982_v57 = vpop.permute.xlu1 %981 }
 0x2c0   : > { %v980_v49 = vpop.permute.xlu0 %979 }
 0x2c1   : > { %v984_v61 = vsel %vm983_vm4, %v980_v49, %v982_v57 }
 0x2c2   : > { %v986_v62 = vsel %vm472_vm5, %v984_v61, 0.0 }
 0x2c3   : > { %v987_v63 = vadd.f32 %v986_v62, %v961_v59  ;;  %v554_v1 = vpop.permute.xlu1 %553 }
 0x2c4   : > { %v552_v0 = vpop.permute.xlu0 %551 }
 0x2c5   : > { %v992_v22 = vadd.f32 %v990_v8, %v987_v63  ;;  %v556_v5 = vsel %vm555_vm6, %v552_v0, %v554_v1 }
 0x2c6   : > { %v558_v11 = vsel %vm465_vm9, %v556_v5, 0.0 }
 0x2c7   : > { %v621_v30 = vpop.permute.xlu1 %620  ;;  %v996_v7 = vrot.slane %v992_v22, %v995_v16 }
 0x2c8   : > { %v619_v10 = vpop.permute.xlu0 %618 }
 0x2c9   : > { %v623_v6 = vsel %vm622_vm7, %v619_v10, %v621_v30  ;;  %998 = vrot.lane.b32.xlu0 %v996_v7, %s1654_s16 }
 0x2ca   : > { %v625_v12 = vsel %vm468_vm3, %v623_v6, 0.0 }
 0x2cb   : > { %v626_v14 = vadd.f32 %v625_v12, %v558_v11  ;;  %v743_v17 = vpop.permute.xlu1 %742 }
 0x2cc   : > { %v741_v18 = vpop.permute.xlu0 %740 }
 0x2cd   : > { %v682_v2 = vadd.f32 %v681_v48, %v626_v14  ;;  %v745_v45 = vsel %vm744_vm10, %v741_v18, %v743_v17  ;;  %1005 = vrot.lane.b32.xlu0 %v1003_v13, %s1655_s28 }
 0x2ce   : > { %v747_v9 = vsel %vm472_vm5, %v745_v45, 0.0 }
 0x2cf   : > { %v810_v19 = vpop.permute.xlu1 %809  ;;  %v748_v60 = vadd.f32 %v747_v9, %v682_v2 }
 0x2d0   : > { %v808_v20 = vpop.permute.xlu0 %807 }
 0x2d1   : > { %v812_v44 = vsel %vm811_vm11, %v808_v20, %v810_v19 }
 0x2d2   : > { %v814_v24 = vsel %vm475_vm12, %v812_v44, 0.0 }
 0x2d3   : > { %v815_v8 = vadd.f32 %v814_v24, %v748_v60 }
 0x2d5   : > { %v820_v15 = vadd.f32 %v2030_v23, %v815_v8 }
 0x2d7   : > { %v822_v25 = vrot.slane %v820_v15, 4 }
 0x2d9   : > { %823 = vrot.lane.b32.xlu1 %v822_v25, %s1654_s16  ;;  %s1657_s16 = smov [#allocation6]  }
 0x2da   : > { %s1516_s17 = sshll.u32 %s1657_s16, 4  ;;  %s1517_s17 = int_to_ptr.vmem [resolvable:$false] %s1516_s17 }
 0x2db   : > { %s1518_s26 = scalar_lea.vmem %s1517_s17, 128 }
 0x33b   : > { %v999_v26 = vpop.permute.xlu0 %998 }
 0x33c   : > { %v1001_v27 = vmul.f32 %v999_v26, %v1906_v34  ;;  %v1002_v28 = vmul.f32 %v999_v26, %v1896_v32 }
 0x33e   : > { %1009 = vrot.lane.b32.xlu0 %v1001_v27, %s1643_s6  ;;  %1011 = vrot.lane.b32.xlu1 %v1002_v28, %s1643_s6 }
 0x33f   : > { %v1006_v34 = vpop.permute.xlu0 %1005 }
 0x34b   : > { %v824_v29 = vpop.permute.xlu1 %823 }
 0x34c   : > { %v826_v35 = vmul.f32 %v824_v29, %v1921_v43  ;;  %v827_v23 = vmul.f32 %v824_v29, %v1925_v47 }
 0x34e   : > { %v1090_v4 = vrot.slane %v826_v35, 4  ;;  %v1091_v31 = vrot.slane %v827_v23, 4 }
 0x350   : > { %1094 = vrot.lane.b32.xlu0 %v1091_v31, %s1643_s6  ;;  %1092 = vrot.lane.b32.xlu1 %v1090_v4, %s1643_s6  ;;  %s1289_s6 = sshll.u32 %s1815_s29, 2 }
 0x351   : > { %s258_s27 = scalar_lea.vmem [#allocation6], %s1289_s6 }
 0x352   : > { %s1193_s13 = sshll.u32 %s258_s27, 4  ;;  %s2074_s13 = int_to_ptr.vmem [resolvable:$true] %s1193_s13 }
 0x353   : > { %s1512_s22 = scalar_lea.vmem %s2074_s13, 64  ;;  %p1519_p6 = scmp.lt.s32.totalorder %s2074_s13, %s1517_s17 }
 0x354   : > { %1172 = vperm.xlu1 %1475, %v1003_v13   ;;  %p1513_p8 = scmp.ne.s32.totalorder %s2074_s13, %s1512_s22  ;;  %p1520_p13 = scmp.lt.s32.totalorder %s1518_s26, %s1512_s22 }
 0x356   : > { %p1514_p12 = pnand %p1513_p8, %p2148_p9  ;;  %p1521_p4 = por %p1520_p13, %p1519_p6 }
 0x358   : > { %p1515_p0 = pneg %p1514_p12 }
 0x35a   : > { %p1522_p5 = pnand %p1521_p4, %p1515_p0 }
 0x3b0   : > { %v1010_v32 = vpop.permute.xlu0 %1009  ;;  %v1012_v36 = vpop.permute.xlu1 %1011 }
 0x3b1   : > { %v1013_v37 = vsel %vm517_vm14, %v1010_v32, %v1012_v36 }
 0x3b2   : > { %1314 = vmatpush3.msk.msra.mxu0 %vm264_vm0, %v1013_v37 }
 0x3b3   : > { %1316 = vmatmul.mubr.msk.f32.vlgmr.msra.gmra.mrb[2].mxu0 %vm373_vm8, %v1006_v34  ;;  %1318 = vmatprep.subr.mxu0 %v1615_v3 }
 0x3b4   : > { %1320 = vmatprep.mubr.msk.f32.mxu0 %vm1656_vm13, %v1615_v3 }
 0x3c2   : > { %v1095_v43 = vpop.permute.xlu0 %1094  ;;  %v1093_v47 = vpop.permute.xlu1 %1092 }
 0x3c3   : > { %v1096_v21 = vsel %vm517_vm14, %v1093_v47, %v1095_v43 }
 0x3c4   : > { %1319 = vmatpush3.msk.msra.mxu0 %vm264_vm0, %v1096_v21 }
 0x3c5   : > { %1321 = vmatmul.mubr.msk.f32.vlgmr.msra.gmra.mrb[4].mxu0 %vm373_vm8, %v1003_v13 }
 0x3d3   : > { %v1173_v40 = vpop.permute.xlu1 %1172 }
 0x486   : > { %v1084_v33 = vpop.f32.mrb[2].mxu0 }
 0x487   : > { %v1317_v38 = vpop.f32.mrb[3].mxu0 }
 0x498   : > { %v1167_v39 = vpop.f32.mrb[4].mxu0 }
 0x499   : > { %v1168_v3 = vadd.f32 %v1167_v39, %v1084_v33  ;;  %v1322_v41 = vpop.f32.mrb[5].mxu0 }
 0x49b   : > { %v1175_v42 = vadd.f32 %v1173_v40, %v1168_v3 }
 0x49d   : > { %1176 = vst [vmem:[%s258_s27] sm:$0xf] %v1175_v42 }
 0x49e   : > { %1525 = shalt.err (!%p1522_p5)
}
 0x49f   : > { %s1526_s29 = scalar_lea.hbm %s2072_s7, 64  ;;  %s1530_s8 = scalar_lea.hbm %s2131_s5, 256 }
 0x4a0   : > { %p1527_p7 = scmp.ne.s32.totalorder %s2072_s7, %s1526_s29  ;;  %p1531_p1 = scmp.lt.u32.totalorder %s2072_s7, %s2131_s5 }
 0x4a1   : > { %p1532_p2 = scmp.lt.u32.totalorder %s1530_s8, %s1526_s29  ;;  %p1534_p8 = scmp.lt.u32.totalorder %s1526_s29, %s2072_s7 }
 0x4a2   : > { %p1528_p10 = pnand %p1527_p7, %p2148_p9 }
 0x4a3   : > { %p1533_p3 = por %p1532_p2, %p1531_p1 }
 0x4a4   : > { %p1529_p11 = pneg %p1528_p10 }
 0x4a5   : > { %p1535_p12 = por %p1534_p8, %p1533_p3 }
 0x4a7   : > { %p1536_p0 = pnand %p1535_p12, %p1529_p11 }
 0x4a9   : > { %1539 = shalt.err (!%p1536_p0)
}
 0x4aa   : > { %1325 = dma.vmem_to_hbm [thread:$0]  (%p2148_p9), %s2074_s13, 64, %s2072_s7, %s1178_s21  }
 0x4ab PF: > { %p1336_p6 = scmp.ge.s32.totalorder %s1610_s25, 2  ;;  %s1205_s27 = sand.u32 1, %s1582_s18  }
 0x4ac   : > { %p2149_p13 = scmp.ne.s32.totalorder %s2140_s12, 0  ;;  %s1206_s10 = scalar_lea.sflag [#allocation5], %s1205_s27 }
 0x4ae   : > { %p1332_p4 = pnand %p1336_p6, %p2149_p13 }
 0x4b0   : > { %1577 = dma.done.wait (!%p1332_p4), %s1206_s10, 64  }
 0x4b1   : > { %1579 = vsyncadd (!%p1332_p4), %s1206_s10, 4294967232  ;;  %s21_s25 = sadd.s32 1, %s1610_s25   ;;  %s2150_s9 = sld [smem:[#allocation9_spill]] }
 0x4b2   : > { %p18_p5 = scmp.ge.s32.totalorder %s21_s25, 6   ;;  %s2151_s13 = sld [smem:[#allocation10_spill]] }
 0x4b3   : > { %s2152_s18 = smov %s1586_s19  ;;  %s2153_s19 = smov %s1590_s20 }
 0x4b4   : > { %s2154_s20 = smov %s1766_s14  ;;  %s2155_s21 = smov %s1602_s23 }
 0x4b5   : > { %s2156_s22 = smov %s1606_s24  ;;  %20 = sbr.rel (!%p18_p5) target bundleno = 7 (0x7), region = 85 }
 0x4b7   : > { %s2157_s23 = smov %s2150_s9 }
 0x4b8   : > { %s2158_s24 = smov %s2151_s13 }
 0x4bc   :  { %1211 = vsyncpa [#allocation4], 1 }
 0x4bd   :  { %1213 = vsyncpa [#allocation4 + $0x1], 1 }
 0x4be   :  { %1214 = vsyncpa [#allocation5], 1 }
 0x4bf   :  { %1216 = vsyncpa [#allocation5 + $0x1], 1 }

</bundles_post_ra>
